<compile_context>
chip_gen: v6e
topology: v6e:2x2x1
jax: 0.10.0
libtpu: 0.0.40
codegen_flags: <defaults>
</compile_context>

<pallas_src>
from functools import partial

import jax
import jax.numpy as jnp
from jax.experimental import pallas as pl
from jax.experimental.pallas import tpu as pltpu

IGNORE_LABEL = -100.0  # xview3 IGNORE_LABEL (assumed constant value)


def _bce_with_logits(x, t):
    # F.binary_cross_entropy_with_logits(..., reduction='none'), stable softplus form.
    return jnp.maximum(x, 0.0) - x * t + jnp.log1p(jnp.exp(-jnp.abs(x)))


def _circlenet_loss_kernel(
    gt_obj_ref, gt_ves_ref, gt_fis_ref, gt_sz_ref, gt_off_ref,
    p_obj_ref, p_ves_ref, p_fis_ref, p_sz_ref, p_off_ref,
    out_ref, *, ignore_index, true_h, tile_h, ragged,
):
    # Single-channel maps arrive as (bB, tile_h, W) thanks to pl.Squeezed(); cast to
    # f32 in-kernel (inputs may be bf16).
    go = gt_obj_ref[...].astype(jnp.float32)
    po = p_obj_ref[...].astype(jnp.float32)

    # Base masks; for a ragged last H tile fold row validity in here so every loss
    # term below is gated by a select (garbage rows can never contribute, even NaN).
    peaks = go == 1.0
    certain = go != ignore_index
    if ragged:
        h0 = pl.program_id(1) * tile_h
        row_ids = h0 + jax.lax.broadcasted_iota(jnp.int32, (tile_h, go.shape[-1]), 0)
        row_valid = row_ids < true_h                  # (tile_h, W), broadcasts over bB
        peaks = jnp.logical_and(peaks, row_valid)
        certain = jnp.logical_and(certain, row_valid)
    neg = jnp.logical_and(certain, jnp.logical_not(peaks))

    # ---- objectness: reduced focal loss (alpha=2, beta=4, eps=0) -----------------
    # One shared exp(-|x|) + softplus identities; exact sigmoid (no approx recip).
    # TODO(synk): exact source of objectness_reduced_focal_loss not provided; the
    # standard CenterNet reduced focal loss with ignore_index masking is used.
    e = jnp.exp(-jnp.abs(po))
    lse = jnp.log1p(e)                                # softplus(-|x|)
    log_sig = -(jnp.maximum(-po, 0.0) + lse)          # log(sigmoid(po))
    log_1m_sig = -(jnp.maximum(po, 0.0) + lse)        # log(1 - sigmoid(po))
    sig = jnp.where(po >= 0.0, 1.0, e) / (1.0 + e)    # exact sigmoid
    pos_loss = jnp.where(peaks, -log_sig * jnp.square(1.0 - sig), 0.0)
    neg_w = jnp.square(jnp.square(1.0 - go))          # (1 - gt)**4
    neg_loss = jnp.where(neg, -log_1m_sig * jnp.square(sig) * neg_w, 0.0)
    obj_row = jnp.sum(pos_loss + neg_loss, axis=1)    # (bB, W)

    # ---- classifiers: SoftBCEWithLogitsLoss * gt_objectness * certain_mask -------
    cls_w = jnp.where(certain, go, 0.0)

    gv = gt_ves_ref[...].astype(jnp.float32)
    pv = p_ves_ref[...].astype(jnp.float32)
    ves_row = jnp.sum(
        jnp.where(gv != ignore_index, _bce_with_logits(pv, gv), 0.0) * cls_w, axis=1)
    vessel_peaks_row = jnp.sum(
        jnp.where(jnp.logical_and(peaks, gv == 1.0), 1.0, 0.0), axis=1)

    gf = gt_fis_ref[...].astype(jnp.float32)
    pf = p_fis_ref[...].astype(jnp.float32)
    fis_row = jnp.sum(
        jnp.where(gf != ignore_index, _bce_with_logits(pf, gf), 0.0) * cls_w, axis=1)

    # ---- size: mse masked by peaks & (gt_size > 0) --------------------------------
    gs = gt_sz_ref[...].astype(jnp.float32)
    ps = p_sz_ref[...].astype(jnp.float32)
    valid_size = jnp.logical_and(peaks, gs > 0.0)
    size_row = jnp.sum(jnp.where(valid_size, jnp.square(ps - gs), 0.0), axis=1)
    num_size_row = jnp.sum(jnp.where(valid_size, 1.0, 0.0), axis=1)

    # ---- offset: mse masked by peaks, summed over the 2 offset channels -----------
    go0 = gt_off_ref[:, 0].astype(jnp.float32)
    go1 = gt_off_ref[:, 1].astype(jnp.float32)
    po0 = p_off_ref[:, 0].astype(jnp.float32)
    po1 = p_off_ref[:, 1].astype(jnp.float32)
    off_row = jnp.sum(
        jnp.where(peaks, jnp.square(po0 - go0) + jnp.square(po1 - go1), 0.0), axis=1)

    peaks_row = jnp.sum(jnp.where(peaks, 1.0, 0.0), axis=1)

    # One lane-dense (bB, 8, W) store of the partial-sum rows for this (b, h) tile.
    out_ref[...] = jnp.stack(
        [obj_row, ves_row, fis_row, size_row, off_row,
         peaks_row, vessel_peaks_row, num_size_row], axis=1)


def _vmem_limit_bytes():
    """Generation-aware VMEM limit: ~96 MiB on 128-MiB parts (v5e/v6e), ~48 MiB on
    64-MiB parts (v7x)."""
    cap = 64 * 1024 * 1024  # conservative fallback (v7x per-core VMEM)
    try:
        cap = int(pltpu.get_tpu_info().vmem_capacity_bytes)
    except Exception:
        pass
    return min((cap * 3) // 4, 100 * 1024 * 1024)


def _choose_tiling(B, H, W, in_bytes_per_pixel, vmem_limit):
    """Pick (bB, tile_h) from the generation/dtype-aware VMEM budget."""
    # Per-pixel cost of one grid step: double-buffered native-dtype input planes
    # plus headroom for ~12 live f32 temporaries inside the kernel body.
    bytes_per_pixel = 2 * in_bytes_per_pixel + 12 * 4
    budget_rows = max(8, (7 * vmem_limit // 10) // (W * bytes_per_pixel))

    if H <= budget_rows:
        # Small maps: fuse batch elements per step, but keep >= 2 grid steps when
        # B >= 2 so both v7x TensorCores get work; bB must divide B (no padding).
        tile_h = H
        cap = max(1, min(budget_rows // H, B // 2 if B >= 2 else 1))
        bB = 1
        for cand in range(min(B, cap), 0, -1):
            if B % cand == 0:
                bB = cand
                break
    else:
        # Large maps: tile H with a multiple-of-8 tile; non-dividing H is handled
        # with a cdiv grid + in-kernel row masking.
        bB = 1
        tile_h = max(8, min(H, (budget_rows // 8) * 8))
    return bB, tile_h


def circlenet_loss(gt_objectness, gt_is_vessel, gt_is_fishing, gt_size, gt_offset,
                   pred_objectness, pred_is_vessel, pred_is_fishing, pred_size,
                   pred_offset, sample_weights, ignore_index=IGNORE_LABEL):
    # Raw NCHW tensors (native dtype, e.g. bf16 model outputs) go straight into the
    # kernel; all casts to f32 happen in-kernel.
    B, _, H, W = gt_objectness.shape
    inputs = (gt_objectness, gt_is_vessel, gt_is_fishing, gt_size, gt_offset,
              pred_objectness, pred_is_vessel, pred_is_fishing, pred_size, pred_offset)
    in_bytes_per_pixel = sum(int(a.shape[1]) * jnp.dtype(a.dtype).itemsize for a in inputs)

    vmem_limit = _vmem_limit_bytes()
    bB, tile_h = _choose_tiling(B, H, W, in_bytes_per_pixel, vmem_limit)
    n_h = -(-H // tile_h)
    ragged = (H % tile_h) != 0
    grid = (B // bB, n_h)

    map_spec = pl.BlockSpec((bB, pl.Squeezed(), tile_h, W), lambda b, h: (b, 0, h, 0))
    off_spec = pl.BlockSpec((bB, 2, tile_h, W), lambda b, h: (b, 0, h, 0))
    out_spec = pl.BlockSpec((bB, pl.Squeezed(), 8, W), lambda b, h: (b, h, 0, 0))

    partials = pl.pallas_call(
        partial(_circlenet_loss_kernel, ignore_index=float(ignore_index),
                true_h=H, tile_h=tile_h, ragged=ragged),
        out_shape=jax.ShapeDtypeStruct((B, n_h, 8, W), jnp.float32),
        grid=grid,
        in_specs=[map_spec, map_spec, map_spec, map_spec, off_spec,
                  map_spec, map_spec, map_spec, map_spec, off_spec],
        out_specs=out_spec,
        compiler_params=pltpu.CompilerParams(
            dimension_semantics=("parallel", "parallel"),
            vmem_limit_bytes=vmem_limit),
    )(*inputs)

    # Glue: cross-tile/lane reduction, per-sample weighting, clamp_min(1), divisions.
    per_sample = jnp.sum(partials, axis=(1, 3))                # (B, 8)
    sw = sample_weights.reshape(-1).astype(jnp.float32)        # (B,)

    sum_obj = jnp.sum(sw * per_sample[:, 0])
    sum_ves = jnp.sum(sw * per_sample[:, 1])
    sum_fis = jnp.sum(sw * per_sample[:, 2])
    sum_siz = jnp.sum(sw * sw * per_sample[:, 3])  # sample_weights applied twice, as in reference
    sum_off = jnp.sum(per_sample[:, 4])            # no sample_weights, as in reference
    num_objects = jnp.maximum(jnp.sum(per_sample[:, 5]), 1.0)
    num_vessels = jnp.maximum(jnp.sum(per_sample[:, 6]), 1.0)
    num_objects_with_length = jnp.maximum(jnp.sum(per_sample[:, 7]), 1.0)

    zero = jnp.float32(0.0)  # regularize_ignored=False path
    out_dtype = pred_objectness.dtype
    losses = {
        "objectness": (sum_obj / num_objects).astype(out_dtype),
        "vessel": (sum_ves / num_objects).astype(out_dtype),
        "fishing": (sum_fis / num_vessels).astype(out_dtype),
        "size": (sum_siz / num_objects_with_length).astype(out_dtype),
        "offset": (sum_off / num_objects).astype(out_dtype),
        "vsl_reg_loss": zero,
        "fsh_reg_loss": zero,
        "obj_reg_loss": zero,
        "num_objects": num_objects,
        "num_vessels": num_vessels,
        "num_objects_with_length": num_objects_with_length,
    }
    return losses


if __name__ == "__main__":
    key = jax.random.PRNGKey(0)
    B, H, W = 2, 16, 128
    ks = jax.random.split(key, 12)

    # GT objectness heatmap in [0, 0.9) with a few exact 1.0 peaks and a few ignore pixels.
    gt_obj = jax.random.uniform(ks[0], (B, 1, H, W), jnp.float32, 0.0, 0.9)
    peak_mask = jax.random.uniform(ks[1], (B, 1, H, W)) < 0.02
    gt_obj = jnp.where(peak_mask, 1.0, gt_obj)
    ign_mask = jnp.logical_and(~peak_mask, jax.random.uniform(ks[2], (B, 1, H, W)) < 0.02)
    gt_obj = jnp.where(ign_mask, IGNORE_LABEL, gt_obj).astype(jnp.float32)

    def cat_map(k):
        r = jax.random.uniform(k, (B, 1, H, W))
        return jnp.where(r < 0.45, 0.0,
                         jnp.where(r < 0.9, 1.0, IGNORE_LABEL)).astype(jnp.float32)

    gt_ves = cat_map(ks[3])
    gt_fis = cat_map(ks[4])
    gt_sz = jnp.where(jax.random.uniform(ks[5], (B, 1, H, W)) < 0.8,
                      jax.random.uniform(ks[6], (B, 1, H, W), jnp.float32, 1.0, 50.0),
                      0.0).astype(jnp.float32)
    gt_off = jax.random.uniform(ks[7], (B, 2, H, W), jnp.float32, -0.5, 0.5)

    # Predictions in bf16 to exercise the reduced-HBM-traffic path (GT stays f32 so
    # exact 1.0 peaks / -100 ignores are preserved).
    p_obj = jax.random.normal(ks[8], (B, 1, H, W), jnp.float32).astype(jnp.bfloat16)
    p_ves = jax.random.normal(ks[9], (B, 1, H, W), jnp.float32).astype(jnp.bfloat16)
    p_fis = jax.random.normal(ks[10], (B, 1, H, W), jnp.float32).astype(jnp.bfloat16)
    p_sz = jax.random.uniform(ks[11], (B, 1, H, W), jnp.float32, 0.0, 60.0).astype(jnp.bfloat16)
    p_off = jax.random.uniform(jax.random.fold_in(key, 99), (B, 2, H, W),
                               jnp.float32, -0.5, 0.5).astype(jnp.bfloat16)
    sample_weights = jnp.array([1.0, 0.5], jnp.float32)

    losses = circlenet_loss(gt_obj, gt_ves, gt_fis, gt_sz, gt_off,
                            p_obj, p_ves, p_fis, p_sz, p_off, sample_weights)
    jax.block_until_ready(losses)
    for name in ("objectness", "vessel", "fishing", "size", "offset"):
        assert bool(jnp.isfinite(losses[name].astype(jnp.float32))), name
    print("KERNEL_OK")
</pallas_src>

<mosaic_0001>
module attributes {stable_mosaic.version = 11 : i64} {
  func.func @_circlenet_loss_kernel(%arg0: i32, %arg1: i32, %arg2: memref<1x1x16x128xf32, #tpu.memory_space<vmem>>, %arg3: memref<1x1x16x128xf32, #tpu.memory_space<vmem>>, %arg4: memref<1x1x16x128xf32, #tpu.memory_space<vmem>>, %arg5: memref<1x1x16x128xf32, #tpu.memory_space<vmem>>, %arg6: memref<1x2x16x128xf32, #tpu.memory_space<vmem>>, %arg7: memref<1x1x16x128xbf16, #tpu.memory_space<vmem>>, %arg8: memref<1x1x16x128xbf16, #tpu.memory_space<vmem>>, %arg9: memref<1x1x16x128xbf16, #tpu.memory_space<vmem>>, %arg10: memref<1x1x16x128xbf16, #tpu.memory_space<vmem>>, %arg11: memref<1x2x16x128xbf16, #tpu.memory_space<vmem>>, %arg12: memref<1x1x8x128xf32, #tpu.memory_space<vmem>>) attributes {dimension_semantics = [#tpu.dimension_semantics<parallel>, #tpu.dimension_semantics<parallel>], iteration_bounds = array<i64: 2, 1>, scalar_prefetch = 0 : i64, scratch_operands = 0 : i64, tpu.core_type = #tpu.core_type<tc>, window_params = [{transform_indices = @transform_0, window_bounds = array<i64: 1, 1, 16, 128>}, {transform_indices = @transform_1, window_bounds = array<i64: 1, 1, 16, 128>}, {transform_indices = @transform_2, window_bounds = array<i64: 1, 1, 16, 128>}, {transform_indices = @transform_3, window_bounds = array<i64: 1, 1, 16, 128>}, {transform_indices = @transform_4, window_bounds = array<i64: 1, 2, 16, 128>}, {transform_indices = @transform_5, window_bounds = array<i64: 1, 1, 16, 128>}, {transform_indices = @transform_6, window_bounds = array<i64: 1, 1, 16, 128>}, {transform_indices = @transform_7, window_bounds = array<i64: 1, 1, 16, 128>}, {transform_indices = @transform_8, window_bounds = array<i64: 1, 1, 16, 128>}, {transform_indices = @transform_9, window_bounds = array<i64: 1, 2, 16, 128>}, {transform_indices = @transform_10, window_bounds = array<i64: 1, 1, 8, 128>}]} {
    %c0 = arith.constant 0 : index
    %c0_0 = arith.constant 0 : index
    %c0_1 = arith.constant 0 : index
    %c0_2 = arith.constant 0 : index
    %0 = vector.load %arg2[%c0, %c0_0, %c0_1, %c0_2] : memref<1x1x16x128xf32, #tpu.memory_space<vmem>>, vector<1x1x16x128xf32>
    %1 = vector.shape_cast %0 : vector<1x1x16x128xf32> to vector<1x16x128xf32>
    %c0_3 = arith.constant 0 : index
    %c0_4 = arith.constant 0 : index
    %c0_5 = arith.constant 0 : index
    %c0_6 = arith.constant 0 : index
    %2 = vector.load %arg7[%c0_3, %c0_4, %c0_5, %c0_6] : memref<1x1x16x128xbf16, #tpu.memory_space<vmem>>, vector<1x1x16x128xbf16>
    %3 = vector.shape_cast %2 : vector<1x1x16x128xbf16> to vector<1x16x128xbf16>
    %4 = arith.extf %3 : vector<1x16x128xbf16> to vector<1x16x128xf32>
    %cst = arith.constant 1.000000e+00 : f32
    %5 = vector.broadcast %cst : f32 to vector<1x16x128xf32>
    %6 = arith.cmpf oeq, %1, %5 : vector<1x16x128xf32>
    %cst_7 = arith.constant -1.000000e+02 : f32
    %7 = vector.broadcast %cst_7 : f32 to vector<1x16x128xf32>
    %8 = arith.cmpf one, %1, %7 : vector<1x16x128xf32>
    %cst_8 = arith.constant dense<true> : vector<1x16x128xi1>
    %9 = arith.xori %6, %cst_8 : vector<1x16x128xi1>
    %10 = arith.andi %8, %9 : vector<1x16x128xi1>
    %11 = math.absf %4 : vector<1x16x128xf32>
    %cst_9 = arith.constant 0.000000e+00 : f32
    %12 = vector.broadcast %cst_9 : f32 to vector<1x16x128xf32>
    %13 = arith.subf %12, %11 : vector<1x16x128xf32>
    %14 = math.exp %13 : vector<1x16x128xf32>
    %15 = math.log1p %14 : vector<1x16x128xf32>
    %cst_10 = arith.constant 0.000000e+00 : f32
    %16 = vector.broadcast %cst_10 : f32 to vector<1x16x128xf32>
    %17 = arith.subf %16, %4 : vector<1x16x128xf32>
    %cst_11 = arith.constant 0.000000e+00 : f32
    %18 = vector.broadcast %cst_11 : f32 to vector<1x16x128xf32>
    %19 = arith.maximumf %17, %18 : vector<1x16x128xf32>
    %20 = arith.addf %19, %15 : vector<1x16x128xf32>
    %cst_12 = arith.constant 0.000000e+00 : f32
    %21 = vector.broadcast %cst_12 : f32 to vector<1x16x128xf32>
    %22 = arith.subf %21, %20 : vector<1x16x128xf32>
    %cst_13 = arith.constant 0.000000e+00 : f32
    %23 = vector.broadcast %cst_13 : f32 to vector<1x16x128xf32>
    %24 = arith.maximumf %4, %23 : vector<1x16x128xf32>
    %25 = arith.addf %24, %15 : vector<1x16x128xf32>
    %cst_14 = arith.constant 0.000000e+00 : f32
    %26 = vector.broadcast %cst_14 : f32 to vector<1x16x128xf32>
    %27 = arith.subf %26, %25 : vector<1x16x128xf32>
    %cst_15 = arith.constant 0.000000e+00 : f32
    %28 = vector.broadcast %cst_15 : f32 to vector<1x16x128xf32>
    %29 = arith.cmpf oge, %4, %28 : vector<1x16x128xf32>
    %cst_16 = arith.constant 1.000000e+00 : f32
    %30 = vector.broadcast %cst_16 : f32 to vector<1x16x128xf32>
    %31 = arith.select %29, %30, %14 : vector<1x16x128xi1>, vector<1x16x128xf32>
    %cst_17 = arith.constant 1.000000e+00 : f32
    %32 = vector.broadcast %cst_17 : f32 to vector<1x16x128xf32>
    %33 = arith.addf %32, %14 : vector<1x16x128xf32>
    %34 = arith.divf %31, %33 : vector<1x16x128xf32>
    %cst_18 = arith.constant 0.000000e+00 : f32
    %35 = vector.broadcast %cst_18 : f32 to vector<1x16x128xf32>
    %36 = arith.subf %35, %22 : vector<1x16x128xf32>
    %cst_19 = arith.constant 1.000000e+00 : f32
    %37 = vector.broadcast %cst_19 : f32 to vector<1x16x128xf32>
    %38 = arith.subf %37, %34 : vector<1x16x128xf32>
    %39 = arith.mulf %38, %38 : vector<1x16x128xf32>
    %40 = arith.mulf %36, %39 : vector<1x16x128xf32>
    %cst_20 = arith.constant 0.000000e+00 : f32
    %41 = vector.broadcast %cst_20 : f32 to vector<1x16x128xf32>
    %42 = arith.select %6, %40, %41 : vector<1x16x128xi1>, vector<1x16x128xf32>
    %cst_21 = arith.constant 1.000000e+00 : f32
    %43 = vector.broadcast %cst_21 : f32 to vector<1x16x128xf32>
    %44 = arith.subf %43, %1 : vector<1x16x128xf32>
    %45 = arith.mulf %44, %44 : vector<1x16x128xf32>
    %46 = arith.mulf %45, %45 : vector<1x16x128xf32>
    %cst_22 = arith.constant 0.000000e+00 : f32
    %47 = vector.broadcast %cst_22 : f32 to vector<1x16x128xf32>
    %48 = arith.subf %47, %27 : vector<1x16x128xf32>
    %49 = arith.mulf %34, %34 : vector<1x16x128xf32>
    %50 = arith.mulf %48, %49 : vector<1x16x128xf32>
    %51 = arith.mulf %50, %46 : vector<1x16x128xf32>
    %cst_23 = arith.constant 0.000000e+00 : f32
    %52 = vector.broadcast %cst_23 : f32 to vector<1x16x128xf32>
    %53 = arith.select %10, %51, %52 : vector<1x16x128xi1>, vector<1x16x128xf32>
    %54 = arith.addf %42, %53 : vector<1x16x128xf32>
    %cst_24 = arith.constant dense<0.000000e+00> : vector<1x128xf32>
    %55 = vector.multi_reduction <add>, %54, %cst_24 [1] : vector<1x16x128xf32> to vector<1x128xf32>
    %cst_25 = arith.constant 0.000000e+00 : f32
    %56 = vector.broadcast %cst_25 : f32 to vector<1x16x128xf32>
    %57 = arith.select %8, %1, %56 : vector<1x16x128xi1>, vector<1x16x128xf32>
    %c0_26 = arith.constant 0 : index
    %c0_27 = arith.constant 0 : index
    %c0_28 = arith.constant 0 : index
    %c0_29 = arith.constant 0 : index
    %58 = vector.load %arg3[%c0_26, %c0_27, %c0_28, %c0_29] : memref<1x1x16x128xf32, #tpu.memory_space<vmem>>, vector<1x1x16x128xf32>
    %59 = vector.shape_cast %58 : vector<1x1x16x128xf32> to vector<1x16x128xf32>
    %c0_30 = arith.constant 0 : index
    %c0_31 = arith.constant 0 : index
    %c0_32 = arith.constant 0 : index
    %c0_33 = arith.constant 0 : index
    %60 = vector.load %arg8[%c0_30, %c0_31, %c0_32, %c0_33] : memref<1x1x16x128xbf16, #tpu.memory_space<vmem>>, vector<1x1x16x128xbf16>
    %61 = vector.shape_cast %60 : vector<1x1x16x128xbf16> to vector<1x16x128xbf16>
    %62 = arith.extf %61 : vector<1x16x128xbf16> to vector<1x16x128xf32>
    %cst_34 = arith.constant -1.000000e+02 : f32
    %63 = vector.broadcast %cst_34 : f32 to vector<1x16x128xf32>
    %64 = arith.cmpf one, %59, %63 : vector<1x16x128xf32>
    %cst_35 = arith.constant 0.000000e+00 : f32
    %65 = vector.broadcast %cst_35 : f32 to vector<1x16x128xf32>
    %66 = arith.maximumf %62, %65 : vector<1x16x128xf32>
    %67 = arith.mulf %62, %59 : vector<1x16x128xf32>
    %68 = arith.subf %66, %67 : vector<1x16x128xf32>
    %69 = math.absf %62 : vector<1x16x128xf32>
    %cst_36 = arith.constant 0.000000e+00 : f32
    %70 = vector.broadcast %cst_36 : f32 to vector<1x16x128xf32>
    %71 = arith.subf %70, %69 : vector<1x16x128xf32>
    %72 = math.exp %71 : vector<1x16x128xf32>
    %73 = math.log1p %72 : vector<1x16x128xf32>
    %74 = arith.addf %68, %73 : vector<1x16x128xf32>
    %cst_37 = arith.constant 0.000000e+00 : f32
    %75 = vector.broadcast %cst_37 : f32 to vector<1x16x128xf32>
    %76 = arith.select %64, %74, %75 : vector<1x16x128xi1>, vector<1x16x128xf32>
    %77 = arith.mulf %76, %57 : vector<1x16x128xf32>
    %cst_38 = arith.constant dense<0.000000e+00> : vector<1x128xf32>
    %78 = vector.multi_reduction <add>, %77, %cst_38 [1] : vector<1x16x128xf32> to vector<1x128xf32>
    %cst_39 = arith.constant 1.000000e+00 : f32
    %79 = vector.broadcast %cst_39 : f32 to vector<1x16x128xf32>
    %80 = arith.cmpf oeq, %59, %79 : vector<1x16x128xf32>
    %81 = arith.andi %6, %80 : vector<1x16x128xi1>
    %cst_40 = arith.constant 1.000000e+00 : f32
    %cst_41 = arith.constant 0.000000e+00 : f32
    %82 = vector.broadcast %cst_40 : f32 to vector<1x16x128xf32>
    %83 = vector.broadcast %cst_41 : f32 to vector<1x16x128xf32>
    %84 = arith.select %81, %82, %83 : vector<1x16x128xi1>, vector<1x16x128xf32>
    %cst_42 = arith.constant dense<0.000000e+00> : vector<1x128xf32>
    %85 = vector.multi_reduction <add>, %84, %cst_42 [1] : vector<1x16x128xf32> to vector<1x128xf32>
    %c0_43 = arith.constant 0 : index
    %c0_44 = arith.constant 0 : index
    %c0_45 = arith.constant 0 : index
    %c0_46 = arith.constant 0 : index
    %86 = vector.load %arg4[%c0_43, %c0_44, %c0_45, %c0_46] : memref<1x1x16x128xf32, #tpu.memory_space<vmem>>, vector<1x1x16x128xf32>
    %87 = vector.shape_cast %86 : vector<1x1x16x128xf32> to vector<1x16x128xf32>
    %c0_47 = arith.constant 0 : index
    %c0_48 = arith.constant 0 : index
    %c0_49 = arith.constant 0 : index
    %c0_50 = arith.constant 0 : index
    %88 = vector.load %arg9[%c0_47, %c0_48, %c0_49, %c0_50] : memref<1x1x16x128xbf16, #tpu.memory_space<vmem>>, vector<1x1x16x128xbf16>
    %89 = vector.shape_cast %88 : vector<1x1x16x128xbf16> to vector<1x16x128xbf16>
    %90 = arith.extf %89 : vector<1x16x128xbf16> to vector<1x16x128xf32>
    %cst_51 = arith.constant -1.000000e+02 : f32
    %91 = vector.broadcast %cst_51 : f32 to vector<1x16x128xf32>
    %92 = arith.cmpf one, %87, %91 : vector<1x16x128xf32>
    %cst_52 = arith.constant 0.000000e+00 : f32
    %93 = vector.broadcast %cst_52 : f32 to vector<1x16x128xf32>
    %94 = arith.maximumf %90, %93 : vector<1x16x128xf32>
    %95 = arith.mulf %90, %87 : vector<1x16x128xf32>
    %96 = arith.subf %94, %95 : vector<1x16x128xf32>
    %97 = math.absf %90 : vector<1x16x128xf32>
    %cst_53 = arith.constant 0.000000e+00 : f32
    %98 = vector.broadcast %cst_53 : f32 to vector<1x16x128xf32>
    %99 = arith.subf %98, %97 : vector<1x16x128xf32>
    %100 = math.exp %99 : vector<1x16x128xf32>
    %101 = math.log1p %100 : vector<1x16x128xf32>
    %102 = arith.addf %96, %101 : vector<1x16x128xf32>
    %cst_54 = arith.constant 0.000000e+00 : f32
    %103 = vector.broadcast %cst_54 : f32 to vector<1x16x128xf32>
    %104 = arith.select %92, %102, %103 : vector<1x16x128xi1>, vector<1x16x128xf32>
    %105 = arith.mulf %104, %57 : vector<1x16x128xf32>
    %cst_55 = arith.constant dense<0.000000e+00> : vector<1x128xf32>
    %106 = vector.multi_reduction <add>, %105, %cst_55 [1] : vector<1x16x128xf32> to vector<1x128xf32>
    %c0_56 = arith.constant 0 : index
    %c0_57 = arith.constant 0 : index
    %c0_58 = arith.constant 0 : index
    %c0_59 = arith.constant 0 : index
    %107 = vector.load %arg5[%c0_56, %c0_57, %c0_58, %c0_59] : memref<1x1x16x128xf32, #tpu.memory_space<vmem>>, vector<1x1x16x128xf32>
    %108 = vector.shape_cast %107 : vector<1x1x16x128xf32> to vector<1x16x128xf32>
    %c0_60 = arith.constant 0 : index
    %c0_61 = arith.constant 0 : index
    %c0_62 = arith.constant 0 : index
    %c0_63 = arith.constant 0 : index
    %109 = vector.load %arg10[%c0_60, %c0_61, %c0_62, %c0_63] : memref<1x1x16x128xbf16, #tpu.memory_space<vmem>>, vector<1x1x16x128xbf16>
    %110 = vector.shape_cast %109 : vector<1x1x16x128xbf16> to vector<1x16x128xbf16>
    %111 = arith.extf %110 : vector<1x16x128xbf16> to vector<1x16x128xf32>
    %cst_64 = arith.constant 0.000000e+00 : f32
    %112 = vector.broadcast %cst_64 : f32 to vector<1x16x128xf32>
    %113 = arith.cmpf ogt, %108, %112 : vector<1x16x128xf32>
    %114 = arith.andi %6, %113 : vector<1x16x128xi1>
    %115 = arith.subf %111, %108 : vector<1x16x128xf32>
    %116 = arith.mulf %115, %115 : vector<1x16x128xf32>
    %cst_65 = arith.constant 0.000000e+00 : f32
    %117 = vector.broadcast %cst_65 : f32 to vector<1x16x128xf32>
    %118 = arith.select %114, %116, %117 : vector<1x16x128xi1>, vector<1x16x128xf32>
    %cst_66 = arith.constant dense<0.000000e+00> : vector<1x128xf32>
    %119 = vector.multi_reduction <add>, %118, %cst_66 [1] : vector<1x16x128xf32> to vector<1x128xf32>
    %cst_67 = arith.constant 1.000000e+00 : f32
    %cst_68 = arith.constant 0.000000e+00 : f32
    %120 = vector.broadcast %cst_67 : f32 to vector<1x16x128xf32>
    %121 = vector.broadcast %cst_68 : f32 to vector<1x16x128xf32>
    %122 = arith.select %114, %120, %121 : vector<1x16x128xi1>, vector<1x16x128xf32>
    %cst_69 = arith.constant dense<0.000000e+00> : vector<1x128xf32>
    %123 = vector.multi_reduction <add>, %122, %cst_69 [1] : vector<1x16x128xf32> to vector<1x128xf32>
    %c0_70 = arith.constant 0 : index
    %c0_71 = arith.constant 0 : index
    %c0_72 = arith.constant 0 : index
    %c0_73 = arith.constant 0 : index
    %124 = vector.load %arg6[%c0_70, %c0_71, %c0_72, %c0_73] : memref<1x2x16x128xf32, #tpu.memory_space<vmem>>, vector<1x1x16x128xf32>
    %125 = vector.shape_cast %124 : vector<1x1x16x128xf32> to vector<1x16x128xf32>
    %c0_74 = arith.constant 0 : index
    %c1 = arith.constant 1 : index
    %c0_75 = arith.constant 0 : index
    %c0_76 = arith.constant 0 : index
    %126 = vector.load %arg6[%c0_74, %c1, %c0_75, %c0_76] : memref<1x2x16x128xf32, #tpu.memory_space<vmem>>, vector<1x1x16x128xf32>
    %127 = vector.shape_cast %126 : vector<1x1x16x128xf32> to vector<1x16x128xf32>
    %c0_77 = arith.constant 0 : index
    %c0_78 = arith.constant 0 : index
    %c0_79 = arith.constant 0 : index
    %c0_80 = arith.constant 0 : index
    %128 = vector.load %arg11[%c0_77, %c0_78, %c0_79, %c0_80] : memref<1x2x16x128xbf16, #tpu.memory_space<vmem>>, vector<1x1x16x128xbf16>
    %129 = vector.shape_cast %128 : vector<1x1x16x128xbf16> to vector<1x16x128xbf16>
    %130 = arith.extf %129 : vector<1x16x128xbf16> to vector<1x16x128xf32>
    %c0_81 = arith.constant 0 : index
    %c1_82 = arith.constant 1 : index
    %c0_83 = arith.constant 0 : index
    %c0_84 = arith.constant 0 : index
    %131 = vector.load %arg11[%c0_81, %c1_82, %c0_83, %c0_84] : memref<1x2x16x128xbf16, #tpu.memory_space<vmem>>, vector<1x1x16x128xbf16>
    %132 = vector.shape_cast %131 : vector<1x1x16x128xbf16> to vector<1x16x128xbf16>
    %133 = arith.extf %132 : vector<1x16x128xbf16> to vector<1x16x128xf32>
    %134 = arith.subf %130, %125 : vector<1x16x128xf32>
    %135 = arith.mulf %134, %134 : vector<1x16x128xf32>
    %136 = arith.subf %133, %127 : vector<1x16x128xf32>
    %137 = arith.mulf %136, %136 : vector<1x16x128xf32>
    %138 = arith.addf %135, %137 : vector<1x16x128xf32>
    %cst_85 = arith.constant 0.000000e+00 : f32
    %139 = vector.broadcast %cst_85 : f32 to vector<1x16x128xf32>
    %140 = arith.select %6, %138, %139 : vector<1x16x128xi1>, vector<1x16x128xf32>
    %cst_86 = arith.constant dense<0.000000e+00> : vector<1x128xf32>
    %141 = vector.multi_reduction <add>, %140, %cst_86 [1] : vector<1x16x128xf32> to vector<1x128xf32>
    %cst_87 = arith.constant 1.000000e+00 : f32
    %cst_88 = arith.constant 0.000000e+00 : f32
    %142 = vector.broadcast %cst_87 : f32 to vector<1x16x128xf32>
    %143 = vector.broadcast %cst_88 : f32 to vector<1x16x128xf32>
    %144 = arith.select %6, %142, %143 : vector<1x16x128xi1>, vector<1x16x128xf32>
    %cst_89 = arith.constant dense<0.000000e+00> : vector<1x128xf32>
    %145 = vector.multi_reduction <add>, %144, %cst_89 [1] : vector<1x16x128xf32> to vector<1x128xf32>
    %146 = vector.shape_cast %55 : vector<1x128xf32> to vector<1x1x128xf32>
    %147 = vector.shape_cast %78 : vector<1x128xf32> to vector<1x1x128xf32>
    %148 = vector.shape_cast %106 : vector<1x128xf32> to vector<1x1x128xf32>
    %149 = vector.shape_cast %119 : vector<1x128xf32> to vector<1x1x128xf32>
    %150 = vector.shape_cast %141 : vector<1x128xf32> to vector<1x1x128xf32>
    %151 = vector.shape_cast %145 : vector<1x128xf32> to vector<1x1x128xf32>
    %152 = vector.shape_cast %85 : vector<1x128xf32> to vector<1x1x128xf32>
    %153 = vector.shape_cast %123 : vector<1x128xf32> to vector<1x1x128xf32>
    %154 = tpu.concatenate %146, %147, %148, %149, %150, %151, %152, %153 in 1 : vector<1x1x128xf32>, vector<1x1x128xf32>, vector<1x1x128xf32>, vector<1x1x128xf32>, vector<1x1x128xf32>, vector<1x1x128xf32>, vector<1x1x128xf32>, vector<1x1x128xf32> -> vector<1x8x128xf32>
    %c0_90 = arith.constant 0 : index
    %c0_91 = arith.constant 0 : index
    %c0_92 = arith.constant 0 : index
    %c0_93 = arith.constant 0 : index
    %155 = vector.load %arg12[%c0_90, %c0_91, %c0_92, %c0_93] : memref<1x1x8x128xf32, #tpu.memory_space<vmem>>, vector<1x1x8x128xf32>
    %156 = vector.shape_cast %155 : vector<1x1x8x128xf32> to vector<1x8x128xf32>
    %157 = vector.shape_cast %154 : vector<1x8x128xf32> to vector<1x1x8x128xf32>
    tpu.vector_store %arg12[%c0_90, %c0_91, %c0_92, %c0_93], %157 {strides = array<i32>} : memref<1x1x8x128xf32, #tpu.memory_space<vmem>>, vector<1x1x8x128xf32>,
    return
  }
  func.func @transform_0(%arg0: i32, %arg1: i32) -> (i32, i32, i32, i32) {
    %c0_i32 = arith.constant 0 : i32
    %c0_i32_0 = arith.constant 0 : i32
    %c0_i32_1 = arith.constant 0 : i32
    return %arg0, %c0_i32, %arg1, %c0_i32_0 : i32, i32, i32, i32
  }
  func.func @transform_1(%arg0: i32, %arg1: i32) -> (i32, i32, i32, i32) {
    %c0_i32 = arith.constant 0 : i32
    %c0_i32_0 = arith.constant 0 : i32
    %c0_i32_1 = arith.constant 0 : i32
    return %arg0, %c0_i32, %arg1, %c0_i32_0 : i32, i32, i32, i32
  }
  func.func @transform_2(%arg0: i32, %arg1: i32) -> (i32, i32, i32, i32) {
    %c0_i32 = arith.constant 0 : i32
    %c0_i32_0 = arith.constant 0 : i32
    %c0_i32_1 = arith.constant 0 : i32
    return %arg0, %c0_i32, %arg1, %c0_i32_0 : i32, i32, i32, i32
  }
  func.func @transform_3(%arg0: i32, %arg1: i32) -> (i32, i32, i32, i32) {
    %c0_i32 = arith.constant 0 : i32
    %c0_i32_0 = arith.constant 0 : i32
    %c0_i32_1 = arith.constant 0 : i32
    return %arg0, %c0_i32, %arg1, %c0_i32_0 : i32, i32, i32, i32
  }
  func.func @transform_4(%arg0: i32, %arg1: i32) -> (i32, i32, i32, i32) {
    %c0_i32 = arith.constant 0 : i32
    %c0_i32_0 = arith.constant 0 : i32
    %c0_i32_1 = arith.constant 0 : i32
    return %arg0, %c0_i32, %arg1, %c0_i32_0 : i32, i32, i32, i32
  }
  func.func @transform_5(%arg0: i32, %arg1: i32) -> (i32, i32, i32, i32) {
    %c0_i32 = arith.constant 0 : i32
    %c0_i32_0 = arith.constant 0 : i32
    %c0_i32_1 = arith.constant 0 : i32
    return %arg0, %c0_i32, %arg1, %c0_i32_0 : i32, i32, i32, i32
  }
  func.func @transform_6(%arg0: i32, %arg1: i32) -> (i32, i32, i32, i32) {
    %c0_i32 = arith.constant 0 : i32
    %c0_i32_0 = arith.constant 0 : i32
    %c0_i32_1 = arith.constant 0 : i32
    return %arg0, %c0_i32, %arg1, %c0_i32_0 : i32, i32, i32, i32
  }
  func.func @transform_7(%arg0: i32, %arg1: i32) -> (i32, i32, i32, i32) {
    %c0_i32 = arith.constant 0 : i32
    %c0_i32_0 = arith.constant 0 : i32
    %c0_i32_1 = arith.constant 0 : i32
    return %arg0, %c0_i32, %arg1, %c0_i32_0 : i32, i32, i32, i32
  }
  func.func @transform_8(%arg0: i32, %arg1: i32) -> (i32, i32, i32, i32) {
    %c0_i32 = arith.constant 0 : i32
    %c0_i32_0 = arith.constant 0 : i32
    %c0_i32_1 = arith.constant 0 : i32
    return %arg0, %c0_i32, %arg1, %c0_i32_0 : i32, i32, i32, i32
  }
  func.func @transform_9(%arg0: i32, %arg1: i32) -> (i32, i32, i32, i32) {
    %c0_i32 = arith.constant 0 : i32
    %c0_i32_0 = arith.constant 0 : i32
    %c0_i32_1 = arith.constant 0 : i32
    return %arg0, %c0_i32, %arg1, %c0_i32_0 : i32, i32, i32, i32
  }
  func.func @transform_10(%arg0: i32, %arg1: i32) -> (i32, i32, i32, i32) {
    %c0_i32 = arith.constant 0 : i32
    %c0_i32_0 = arith.constant 0 : i32
    %c0_i32_1 = arith.constant 0 : i32
    return %arg0, %arg1, %c0_i32, %c0_i32_0 : i32, i32, i32, i32
  }
}

</mosaic_0001>

<bundles_post_ra>
// kernel: tpu_custom_call.1
= control target key start
LH: loop header
LB: loop body
LE: loop exit
PB: predicated region body
PF: predicated region fallthrough
CT: control target
= control target key end

     0   :  { %s2752_s0 = inlined_call_operand.hbm [shape: f32[2,1,16,128], index: 0, kind: input, shape index: {}]   ;;  %s2753_s1 = inlined_call_operand.hbm [shape: f32[2,1,16,128], index: 1, kind: input, shape index: {}]   ;;  %s2754_s2 = inlined_call_operand.hbm [shape: f32[2,1,16,128], index: 2, kind: input, shape index: {}]   ;;  %s2755_s3 = inlined_call_operand.hbm [shape: f32[2,1,16,128], index: 3, kind: input, shape index: {}]   ;;  %s2756_s4 = inlined_call_operand.hbm [shape: f32[2,2,16,128], index: 4, kind: input, shape index: {}]   ;;  %s2757_s5 = inlined_call_operand.hbm [shape: bf16[2,1,16,128], index: 5, kind: input, shape index: {}]   ;;  %s2758_s6 = inlined_call_operand.hbm [shape: bf16[2,1,16,128], index: 6, kind: input, shape index: {}]   ;;  %s2759_s7 = inlined_call_operand.hbm [shape: bf16[2,1,16,128], index: 7, kind: input, shape index: {}]   ;;  %s2760_s8 = inlined_call_operand.hbm [shape: bf16[2,1,16,128], index: 8, kind: input, shape index: {}]   ;;  %s2761_s9 = inlined_call_operand.hbm [shape: bf16[2,2,16,128], index: 9, kind: input, shape index: {}]   ;;  %s2762_s10 = inlined_call_operand.hbm [shape: f32[2,1,8,128], index: 10, kind: output, shape index: {}]  }
   0x1   :  { %2788 = sst [smem:[#allocation39_spill]] %s2752_s0 }
   0x2   :  { %2789 = sst [smem:[#allocation40_spill]] %s2753_s1 }
   0x3   :  { %2790 = sst [smem:[#allocation41_spill]] %s2755_s3 }
   0x4   :  { %2791 = sst [smem:[#allocation42_spill]] %s2757_s5 }
   0x5   :  { %2792 = sst [smem:[#allocation43_spill]] %s2762_s10 }
   0x6   :  { %15 = vsyncpa [#allocation3], 0 }
   0x7   :  { %17 = vsyncpa [#allocation3 + $0x1], 0 }
   0x8   :  { %18 = vsyncpa [#allocation6], 0 }
   0x9   :  { %20 = vsyncpa [#allocation6 + $0x1], 0 }
   0xa   :  { %21 = vsyncpa [#allocation9], 0 }
   0xb   :  { %23 = vsyncpa [#allocation9 + $0x1], 0 }
   0xc   :  { %24 = vsyncpa [#allocation12], 0 }
   0xd   :  { %26 = vsyncpa [#allocation12 + $0x1], 0 }
   0xe   :  { %27 = vsyncpa [#allocation15], 0 }
   0xf   :  { %29 = vsyncpa [#allocation15 + $0x1], 0 }
  0x10   :  { %30 = vsyncpa [#allocation18], 0 }
  0x11   :  { %32 = vsyncpa [#allocation18 + $0x1], 0 }
  0x12   :  { %33 = vsyncpa [#allocation4], 0 }
  0x13   :  { %35 = vsyncpa [#allocation4 + $0x1], 0  ;;  %s2102_s13 = smov 0   ;;  %s2104_s14 = smov 0  }
  0x14   :  { %s2106_s15 = smov 0   ;;  %s2108_s16 = smov 0  }
  0x15   :  { %s2110_s17 = smov 0   ;;  %s2112_s18 = smov 0  }
  0x16 LB: > { %2793 = sst [smem:[#allocation27_spill]] %s2008_s13  ;;  %s2133_s19 = sadd.s32 4294967295, %s2028_s18   ;;  %s2028_s18 = sphi %s2112_s18, %s41_s18   ;;  %s2024_s17 = sphi %s2110_s17, %s2866_s17   ;;  %s2020_s16 = sphi %s2108_s16, %s2865_s16   ;;  %s2016_s15 = sphi %s2106_s15, %s2863_s15   ;;  %s2012_s14 = sphi %s2104_s14, %s2862_s14   ;;  %s2008_s13 = sphi %s2102_s13, %s2861_s13  }
  0x17   : > { %2794 = sst [smem:[#allocation28_spill]] %s2012_s14  ;;  %s1419_s20 = sadd.s32 4294967294, %s2028_s18  }
  0x18   : > { %2795 = sst [smem:[#allocation29_spill]] %s2016_s15  ;;  %s53_s21 = sadd.s32 1, %s2024_s17 }
  0x19   : > { %2796 = sst [smem:[#allocation30_spill]] %s2020_s16  ;;  %s62_s22 = sadd.s32 1, %s2016_s15 }
  0x1a   : > { %2797 = sst [smem:[#allocation31_spill]] %s2028_s18  ;;  %p55_p0 = scmp.ge.s32.totalorder %s53_s21, 2 }
  0x1b   : > { %2798 = sst [smem:[#allocation32_spill]] %s2133_s19  ;;  %p69_p1 = scmp.ne.s32.totalorder %s2016_s15, %s2012_s14 }
  0x1c   : > { %p70_p2 = scmp.eq.s32.totalorder %s2028_s18, 0  ;;  %p75_p3 = scmp.ne.s32.totalorder %s2012_s14, %s2008_s13 }
  0x1d   : > { %s2868_s21 = smov (%p55_p0, %s53_s21), 0  ;;  %p76_p5 = scmp.eq.s32.totalorder %s2133_s19, 0 }
  0x1e   : > { %2799 = sst [smem:[#allocation33_spill]] %s2868_s21  ;;  %p2145_p4 = por %p70_p2, %p69_p1 }
  0x1f   : > { %s57_s24 = ssub.s32 %s2024_s17, %s2868_s21  ;;  %p353_p6 = scmp.eq.s32.totalorder %s2133_s19, 1 }
  0x20   : > { %p60_p7 = scmp.eq.s32.totalorder %s57_s24, 0  ;;  %p2153_p8 = por %p76_p5, %p75_p3 }
  0x21   : > { %p2157_p9 = por %p353_p6, %p69_p1  ;;  %p359_p10 = scmp.eq.s32.totalorder %s1419_s20, 1 }
  0x22   : > { %s2801_s25 = scalar_select %p2153_p8, 1, 0 }
  0x23   : > { %s2803_s26 = scalar_select %p2157_p9, 1, 0 }
  0x24   : > { %2802 = sst [smem:[#allocation34_spill]] %s2801_s25  ;;  %p2164_p11 = por %p359_p10, %p75_p3 }
  0x25   : > { %2804 = sst [smem:[#allocation35_spill]] %s2803_s26  ;;  %p1564_p13 = scmp.lt.s32.totalorder %s2028_s18, 2 }
  0x26   : > { %s2162_s27 = scalar_select %p60_p7, %s2016_s15, %s62_s22  }
  0x27   : > { %s2806_s28 = scalar_select %p2164_p11, 1, 0 }
  0x28   : > { %2805 = sst [smem:[#allocation36_spill]] %s2162_s27  ;;  %s2171_s29 = sand.u32 1, %s2016_s15  }
  0x29   : > { %2807 = sst [smem:[#allocation37_spill]] %s2806_s28  ;;  %s2174_s30 = sshll.u32 %s2171_s29, 4 }
  0x2a   : > { %s2177_s11 = sshll.u32 %s2024_s17, 8  ;;  %p2181_p0 = pnand %p1564_p13, %p2145_p4 }
  0x2b   : > { %s2186_s20 = sand.u32 1, %s2028_s18   ;;  %s2809_s1 = sld [smem:[#allocation40_spill]] }
  0x2c   : > { %s406_s27 = scalar_lea.vmem [#allocation5], %s2174_s30  ;;  %p1452_p1 = scmp.ge.s32.totalorder %s2028_s18, 1 }
  0x2d   : > { %s415_s15 = sshll.u32 %s406_s27, 4  ;;  %p607_p2 = scmp.lt.s32.totalorder %s2028_s18, 3  ;;  %s416_s15 = int_to_ptr.vmem [resolvable:$true] %s415_s15 }
  0x2e   : > { %p2198_p3 = pneg %p2181_p0  ;;  %s1661_s13 = scalar_lea.vmem %s416_s15, 256 }
  0x2f   : > { %p1662_p4 = scmp.ne.s32.totalorder %s416_s15, %s1661_s13  ;;  %s2030_s22 = smov [#allocation5]  }
  0x30   : > { %s1666_s24 = sshll.u32 %s2030_s22, 4  ;;  %s1667_s24 = int_to_ptr.vmem [resolvable:$false] %s1666_s24 }
  0x31   : > { %s414_s21 = scalar_lea.hbm %s2809_s1, %s2177_s11  ;;  %p1664_p5 = pnand %p1662_p4, %p2198_p3 }
  0x32   : > { %s1668_s1 = scalar_lea.vmem %s1667_s24, 512  ;;  %p1669_p7 = scmp.lt.s32.totalorder %s416_s15, %s1667_s24 }
  0x33   : > { %p1665_p6 = pneg %p1664_p5  ;;  %p1670_p10 = scmp.lt.s32.totalorder %s1668_s1, %s1661_s13 }
  0x35   : > { %p1671_p13 = por %p1670_p10, %p1669_p7 }
  0x37   : > { %p1672_p12 = pnand %p1671_p13, %p1665_p6 }
  0x39   : > { %1675 = shalt.err (!%p1672_p12)
}
  0x3a   : > { %s2778_s27 = smov 128   ;;  %s2780_s28 = smov 8  }
  0x3b   : > { %s2811_s22 = scalar_lea.sflag [#allocation6], %s2186_s20  ;;  %p2215_p12 = pnand %p1452_p1, %p607_p2 }
  0x3c   : > { %1535 = dma.hbm_to_vmem [thread:$0]  (!%p2181_p0), %s414_s21, 256, %s416_s15, %s2811_s22, %s2778_s27, %s2778_s27, %s2780_s28  }
  0x3d   : > { %s2812_s1 = scalar_select %p2215_p12, 1, 0 }
  0x3e   : > { %s2814_s3 = sld [smem:[#allocation41_spill]]  ;;  %s452_s26 = scalar_lea.vmem [#allocation8], %s2174_s30 }
  0x3f   : > { %2813 = sst [smem:[#allocation38_spill]] %s2812_s1  ;;  %s461_s16 = sshll.u32 %s452_s26, 4  ;;  %s462_s16 = int_to_ptr.vmem [resolvable:$true] %s461_s16 }
  0x40   : > { %s2225_s19 = sshll.u32 %s2171_s29, 3  ;;  %s2777_s25 = scalar_lea.sflag [#allocation9], %s2186_s20 }
  0x41   : > { %s1689_s14 = scalar_lea.vmem %s462_s16, 256  ;;  %s2033_s15 = smov [#allocation8]  }
  0x42   : > { %p1690_p4 = scmp.ne.s32.totalorder %s462_s16, %s1689_s14  ;;  %s1694_s21 = sshll.u32 %s2033_s15, 4  ;;  %s1695_s21 = int_to_ptr.vmem [resolvable:$false] %s1694_s21 }
  0x43   : > { %s1696_s22 = scalar_lea.vmem %s1695_s21, 512  ;;  %p1697_p1 = scmp.lt.s32.totalorder %s462_s16, %s1695_s21 }
  0x44   : > { %s460_s10 = scalar_lea.hbm %s2814_s3, %s2177_s11  ;;  %p1692_p5 = pnand %p1690_p4, %p2198_p3 }
  0x45   : > { %p1698_p2 = scmp.lt.s32.totalorder %s1696_s22, %s1689_s14 }
  0x46   : > { %p1693_p6 = pneg %p1692_p5 }
  0x47   : > { %p1699_p7 = por %p1698_p2, %p1697_p1 }
  0x49   : > { %p1700_p10 = pnand %p1699_p7, %p1693_p6 }
  0x4b   : > { %1703 = shalt.err (!%p1700_p10)
}
  0x4c   : > { %1541 = dma.hbm_to_vmem [thread:$0]  (!%p2181_p0), %s460_s10, 256, %s462_s16, %s2777_s25, %s2778_s27, %s2778_s27, %s2780_s28  }
  0x4d   : > { %s2238_s26 = sshll.u32 %s2024_s17, 7  ;;  %s2815_s5 = sld [smem:[#allocation42_spill]] }
  0x4e   : > { %s498_s15 = scalar_lea.vmem [#allocation11], %s2225_s19  ;;  %s2782_s22 = scalar_lea.sflag [#allocation12], %s2186_s20 }
  0x4f   : > { %s507_s21 = sshll.u32 %s498_s15, 4  ;;  %s2034_s18 = smov [#allocation11]   ;;  %s508_s21 = int_to_ptr.vmem [resolvable:$true] %s507_s21 }
  0x50   : > { %s1717_s3 = scalar_lea.vmem %s508_s21, 128  ;;  %s1722_s1 = sshll.u32 %s2034_s18, 4  ;;  %s1723_s1 = int_to_ptr.vmem [resolvable:$false] %s1722_s1 }
  0x51   : > { %p1718_p13 = scmp.ne.s32.totalorder %s508_s21, %s1717_s3  ;;  %s1724_s10 = scalar_lea.vmem %s1723_s1, 256 }
  0x52   : > { %p1725_p6 = scmp.lt.s32.totalorder %s508_s21, %s1723_s1  ;;  %p1726_p1 = scmp.lt.s32.totalorder %s1724_s10, %s1717_s3 }
  0x53   : > { %s506_s24 = scalar_lea.hbm %s2815_s5, %s2238_s26  ;;  %p1720_p4 = pnand %p1718_p13, %p2198_p3 }
  0x54   : > { %p1727_p2 = por %p1726_p1, %p1725_p6 }
  0x55   : > { %p1721_p5 = pneg %p1720_p4 }
  0x57   : > { %p1728_p7 = pnand %p1727_p2, %p1721_p5 }
  0x59   : > { %1731 = shalt.err (!%p1728_p7)
}
  0x5a   : > { %s2784_s16 = smov 64   ;;  %s2786_s13 = smov 4  }
  0x5b   : > { %1547 = dma.hbm_to_vmem [thread:$0]  (!%p2181_p0), %s506_s24, 128, %s508_s21, %s2782_s22, %s2784_s16, %s2784_s16, %s2786_s13  }
  0x5c   : > { %s552_s3 = scalar_lea.hbm %s2759_s7, %s2238_s26  ;;  %s544_s14 = scalar_lea.vmem [#allocation14], %s2225_s19 }
  0x5d   : > { %s553_s15 = sshll.u32 %s544_s14, 4  ;;  %s2783_s10 = scalar_lea.sflag [#allocation15], %s2186_s20  ;;  %s554_s15 = int_to_ptr.vmem [resolvable:$true] %s553_s15 }
  0x5e   : > { %s1745_s25 = scalar_lea.vmem %s554_s15, 128  ;;  %s2037_s27 = smov [#allocation14]  }
  0x5f   : > { %p1746_p10 = scmp.ne.s32.totalorder %s554_s15, %s1745_s25  ;;  %s1750_s28 = sshll.u32 %s2037_s27, 4  ;;  %s1751_s28 = int_to_ptr.vmem [resolvable:$false] %s1750_s28 }
  0x60   : > { %s1752_s5 = scalar_lea.vmem %s1751_s28, 256  ;;  %p1753_p5 = scmp.lt.s32.totalorder %s554_s15, %s1751_s28 }
  0x61   : > { %p1748_p13 = pnand %p1746_p10, %p2198_p3  ;;  %p1754_p6 = scmp.lt.s32.totalorder %s1752_s5, %s1745_s25 }
  0x63   : > { %p1749_p4 = pneg %p1748_p13  ;;  %p1755_p1 = por %p1754_p6, %p1753_p5 }
  0x65   : > { %p1756_p2 = pnand %p1755_p1, %p1749_p4 }
  0x67   : > { %1759 = shalt.err (!%p1756_p2)
}
  0x68   : > { %1553 = dma.hbm_to_vmem [thread:$0]  (!%p2181_p0), %s552_s3, 128, %s554_s15, %s2783_s10, %s2784_s16, %s2784_s16, %s2786_s13  }
  0x69   : > { %s2816_s0 = sld [smem:[#allocation39_spill]]  ;;  %s383_s5 = scalar_lea.vmem [#allocation2], %s2174_s30 }
  0x6a   : > { %s392_s25 = sshll.u32 %s383_s5, 4  ;;  %s380_s21 = scalar_lea.sflag [#allocation3], %s2171_s29  ;;  %s393_s25 = int_to_ptr.vmem [resolvable:$true] %s392_s25 }
  0x6b   : > { %s1773_s18 = scalar_lea.vmem %s393_s25, 256  ;;  %s2038_s1 = smov [#allocation2]  }
  0x6c   : > { %p1774_p7 = scmp.ne.s32.totalorder %s393_s25, %s1773_s18  ;;  %s1778_s14 = sshll.u32 %s2038_s1, 4  ;;  %s1779_s14 = int_to_ptr.vmem [resolvable:$false] %s1778_s14 }
  0x6d   : > { %s1780_s22 = scalar_lea.vmem %s1779_s14, 512  ;;  %p1781_p4 = scmp.lt.s32.totalorder %s393_s25, %s1779_s14 }
  0x6e   : > { %p1776_p10 = pnand %p1774_p7, %p2198_p3  ;;  %p1782_p5 = scmp.lt.s32.totalorder %s1780_s22, %s1773_s18 }
  0x6f   : > { %s391_s28 = scalar_lea.hbm %s2816_s0, %s2177_s11 }
  0x70   : > { %p1777_p13 = pneg %p1776_p10  ;;  %p1783_p6 = por %p1782_p5, %p1781_p4 }
  0x72   : > { %p1784_p1 = pnand %p1783_p6, %p1777_p13 }
  0x74   : > { %1787 = shalt.err (!%p1784_p1)
}
  0x75   : > { %s2817_s3 = smov 8   ;;  %s2818_s15 = smov 128  }
  0x76   : > { %1532 = dma.hbm_to_vmem [thread:$0]  (!%p2181_p0), %s391_s28, 256, %s393_s25, %s380_s21, %s2818_s15, %s2818_s15, %s2817_s3  }
  0x77   : > { %s437_s5 = scalar_lea.hbm %s2754_s2, %s2177_s11  ;;  %s429_s1 = scalar_lea.vmem [#allocation7], %s2174_s30 }
  0x78   : > { %s438_s14 = sshll.u32 %s429_s1, 4  ;;  %s1434_s22 = sshll.u32 %s2171_s29, 5  ;;  %s439_s14 = int_to_ptr.vmem [resolvable:$true] %s438_s14 }
  0x79   : > { %s1801_s18 = scalar_lea.vmem %s439_s14, 256  ;;  %s2039_s10 = smov [#allocation7]  }
  0x7a   : > { %p1802_p2 = scmp.ne.s32.totalorder %s439_s14, %s1801_s18  ;;  %s1806_s16 = sshll.u32 %s2039_s10, 4  ;;  %s1807_s16 = int_to_ptr.vmem [resolvable:$false] %s1806_s16 }
  0x7b   : > { %s1808_s13 = scalar_lea.vmem %s1807_s16, 512  ;;  %p1809_p13 = scmp.lt.s32.totalorder %s439_s14, %s1807_s16 }
  0x7c   : > { %p1804_p7 = pnand %p1802_p2, %p2198_p3  ;;  %p1810_p4 = scmp.lt.s32.totalorder %s1808_s13, %s1801_s18 }
  0x7e   : > { %p1805_p10 = pneg %p1804_p7  ;;  %p1811_p5 = por %p1810_p4, %p1809_p13 }
  0x80   : > { %p1812_p6 = pnand %p1811_p5, %p1805_p10 }
  0x82   : > { %1815 = shalt.err (!%p1812_p6)
}
  0x83   : > { %s2819_s28 = scalar_lea.sflag [#allocation6], %s2186_s20  ;;  %s1476_s25 = sshll.u32 %s2024_s17, 9 }
  0x84   : > { %1538 = dma.hbm_to_vmem [thread:$0]  (!%p2181_p0), %s437_s5, 256, %s439_s14, %s2819_s28, %s2818_s15, %s2818_s15, %s2817_s3  }
  0x85   : > { %s483_s27 = scalar_lea.hbm %s2756_s4, %s1476_s25  ;;  %s475_s16 = scalar_lea.vmem [#allocation10], %s1434_s22 }
  0x86   : > { %s484_s13 = sshll.u32 %s475_s16, 4  ;;  %s2040_s1 = smov [#allocation10]   ;;  %s485_s13 = int_to_ptr.vmem [resolvable:$true] %s484_s13 }
  0x87   : > { %s1829_s24 = scalar_lea.vmem %s485_s13, 512  ;;  %s1834_s18 = sshll.u32 %s2040_s1, 4  ;;  %s1835_s18 = int_to_ptr.vmem [resolvable:$false] %s1834_s18 }
  0x88   : > { %p1830_p1 = scmp.ne.s32.totalorder %s485_s13, %s1829_s24  ;;  %s1836_s0 = scalar_lea.vmem %s1835_s18, 1024 }
  0x89   : > { %p1837_p10 = scmp.lt.s32.totalorder %s485_s13, %s1835_s18  ;;  %p1838_p13 = scmp.lt.s32.totalorder %s1836_s0, %s1829_s24 }
  0x8a   : > { %p1832_p2 = pnand %p1830_p1, %p2198_p3 }
  0x8b   : > { %p1839_p4 = por %p1838_p13, %p1837_p10 }
  0x8c   : > { %p1833_p7 = pneg %p1832_p2 }
  0x8e   : > { %p1840_p5 = pnand %p1839_p4, %p1833_p7 }
  0x90   : > { %1843 = shalt.err (!%p1840_p5)
}
  0x91   : > { %s2820_s5 = scalar_lea.sflag [#allocation9], %s2186_s20  ;;  %s529_s28 = scalar_lea.hbm %s2758_s6, %s2238_s26 }
  0x92   : > { %1544 = dma.hbm_to_vmem [thread:$0]  (!%p2181_p0), %s483_s27, 512, %s485_s13, %s2820_s5, %s2818_s15, %s2818_s15, %s2817_s3  }
  0x93   : > { %s521_s25 = scalar_lea.vmem [#allocation13], %s2225_s19  ;;  %s2041_s10 = smov [#allocation13]  }
  0x94   : > { %s530_s0 = sshll.u32 %s521_s25, 4  ;;  %s1862_s16 = sshll.u32 %s2041_s10, 4  ;;  %s531_s0 = int_to_ptr.vmem [resolvable:$true] %s530_s0  ;;  %s1863_s16 = int_to_ptr.vmem [resolvable:$false] %s1862_s16 }
  0x95   : > { %s1857_s21 = scalar_lea.vmem %s531_s0, 128  ;;  %s1864_s24 = scalar_lea.vmem %s1863_s16, 256 }
  0x96   : > { %p1858_p6 = scmp.ne.s32.totalorder %s531_s0, %s1857_s21  ;;  %p1865_p7 = scmp.lt.s32.totalorder %s531_s0, %s1863_s16 }
  0x97   : > { %p1866_p10 = scmp.lt.s32.totalorder %s1864_s24, %s1857_s21 }
  0x98   : > { %p1860_p1 = pnand %p1858_p6, %p2198_p3 }
  0x99   : > { %p1867_p13 = por %p1866_p10, %p1865_p7 }
  0x9a   : > { %p1861_p2 = pneg %p1860_p1 }
  0x9c   : > { %p1868_p4 = pnand %p1867_p13, %p1861_p2 }
  0x9e   : > { %1871 = shalt.err (!%p1868_p4)
}
  0x9f   : > { %s2821_s3 = smov 4   ;;  %s2822_s15 = smov 64  }
  0xa0   : > { %s2823_s27 = scalar_lea.sflag [#allocation12], %s2186_s20  ;;  %s575_s18 = scalar_lea.hbm %s2760_s8, %s2238_s26 }
  0xa1   : > { %1550 = dma.hbm_to_vmem [thread:$0]  (!%p2181_p0), %s529_s28, 128, %s531_s0, %s2823_s27, %s2822_s15, %s2822_s15, %s2821_s3  }
  0xa2   : > { %s567_s5 = scalar_lea.vmem [#allocation16], %s2225_s19  ;;  %s2042_s25 = smov [#allocation16]  }
  0xa3   : > { %s576_s14 = sshll.u32 %s567_s5, 4  ;;  %s1890_s21 = sshll.u32 %s2042_s25, 4  ;;  %s577_s14 = int_to_ptr.vmem [resolvable:$true] %s576_s14  ;;  %s1891_s21 = int_to_ptr.vmem [resolvable:$false] %s1890_s21 }
  0xa4   : > { %s1885_s22 = scalar_lea.vmem %s577_s14, 128  ;;  %s1892_s10 = scalar_lea.vmem %s1891_s21, 256 }
  0xa5   : > { %p1886_p5 = scmp.ne.s32.totalorder %s577_s14, %s1885_s22  ;;  %p1893_p2 = scmp.lt.s32.totalorder %s577_s14, %s1891_s21 }
  0xa6   : > { %p1894_p7 = scmp.lt.s32.totalorder %s1892_s10, %s1885_s22 }
  0xa7   : > { %p1888_p6 = pnand %p1886_p5, %p2198_p3 }
  0xa8   : > { %p1895_p10 = por %p1894_p7, %p1893_p2 }
  0xa9   : > { %p1889_p1 = pneg %p1888_p6 }
  0xab   : > { %p1896_p13 = pnand %p1895_p10, %p1889_p1 }
  0xad   : > { %1899 = shalt.err (!%p1896_p13)
}
  0xae   : > { %s2824_s19 = scalar_lea.sflag [#allocation15], %s2186_s20  ;;  %s598_s0 = scalar_lea.hbm %s2761_s9, %s2177_s11 }
  0xaf   : > { %1556 = dma.hbm_to_vmem [thread:$0]  (!%p2181_p0), %s575_s18, 128, %s577_s14, %s2824_s19, %s2822_s15, %s2822_s15, %s2821_s3  }
  0xb0   : > { %s590_s16 = scalar_lea.vmem [#allocation17], %s2174_s30  ;;  %s587_s27 = scalar_lea.sflag [#allocation18], %s2171_s29 }
  0xb1   : > { %s599_s24 = sshll.u32 %s590_s16, 4  ;;  %s2043_s1 = smov [#allocation17]   ;;  %s600_s24 = int_to_ptr.vmem [resolvable:$true] %s599_s24 }
  0xb2   : > { %s1913_s13 = scalar_lea.vmem %s600_s24, 256  ;;  %s1918_s20 = sshll.u32 %s2043_s1, 4  ;;  %s1919_s20 = int_to_ptr.vmem [resolvable:$false] %s1918_s20 }
  0xb3   : > { %p1914_p4 = scmp.ne.s32.totalorder %s600_s24, %s1913_s13  ;;  %s1920_s5 = scalar_lea.vmem %s1919_s20, 512 }
  0xb4   : > { %p1921_p1 = scmp.lt.s32.totalorder %s600_s24, %s1919_s20  ;;  %p1922_p2 = scmp.lt.s32.totalorder %s1920_s5, %s1913_s13 }
  0xb5   : > { %p1916_p5 = pnand %p1914_p4, %p2198_p3 }
  0xb6   : > { %p1923_p7 = por %p1922_p2, %p1921_p1 }
  0xb7   : > { %p1917_p6 = pneg %p1916_p5 }
  0xb9   : > { %p1924_p10 = pnand %p1923_p7, %p1917_p6 }
  0xbb   : > { %1927 = shalt.err (!%p1924_p10)
}
  0xbc   : > { %1559 = dma.hbm_to_vmem [thread:$0]  (!%p2181_p0), %s598_s0, 256, %s600_s24, %s587_s27, %s2822_s15, %s2822_s15, %s2821_s3  }
  0xbd   : > { %611 = sbr.rel (%p2215_p12) target bundleno = 323 (0x143), region = 60  ;;  %s2826_s30 = sld [smem:[#allocation28_spill]] (!%p2215_p12) }
  0xc3   : > { %s2355_s23 = sand.u32 1, %s2826_s30  }
  0xc4   : > { %s2358_s18 = sshll.u32 %s2355_s23, 4  ;;  %s614_s14 = scalar_lea.sflag [#allocation3], %s2355_s23 }
  0xc5   : > { %s617_s22 = scalar_lea.vmem [#allocation2], %s2358_s18 }
  0xc6   : > { %1979 = dma.done.wait (%p2153_p8), %s614_s14, 256  }
  0xc7   : > { %1981 = vsyncadd (%p2153_p8), %s614_s14, 4294967040  ;;  %s2828_s12 = sld [smem:[#allocation32_spill]]  ;;  %s626_s25 = scalar_lea.vmem [#allocation5], %s2358_s18 }
  0xcd   : > { %s622_s3 = sand.u32 1, %s2828_s12  }
  0xce   : > { %s623_s15 = scalar_lea.sflag [#allocation6], %s622_s3 }
  0xcf   : > { %1983 = dma.done.wait (%p2153_p8), %s623_s15, 512  }
  0xd0   : > { %1985 = vsyncadd (%p2153_p8), %s623_s15, 4294966784  ;;  %s635_s21 = scalar_lea.vmem [#allocation7], %s2358_s18  ;;  %s641_s10 = scalar_lea.sflag [#allocation9], %s622_s3 }
  0xd1   : > { %s644_s19 = scalar_lea.vmem [#allocation8], %s2358_s18 }
  0xd2   : > { %1987 = dma.done.wait (%p2153_p8), %s641_s10, 768  }
  0xd3   : > { %1989 = vsyncadd (%p2153_p8), %s641_s10, 4294966528  ;;  %s1457_s26 = sshll.u32 %s2355_s23, 5  ;;  %s2380_s28 = sshll.u32 %s2355_s23, 3 }
  0xd4   : > { %s2382_s0 = scalar_lea.vmem [#allocation10], %s1457_s26  ;;  %s659_s16 = scalar_lea.sflag [#allocation12], %s622_s3 }
  0xd5   : > { %s662_s24 = scalar_lea.vmem [#allocation11], %s2380_s28 }
  0xd6   : > { %1991 = dma.done.wait (%p2153_p8), %s659_s16, 256  }
  0xd7   : > { %1993 = vsyncadd (%p2153_p8), %s659_s16, 4294967040  ;;  %s671_s27 = scalar_lea.vmem [#allocation13], %s2380_s28  ;;  %s677_s13 = scalar_lea.sflag [#allocation15], %s622_s3 }
  0xd8   : > { %s680_s1 = scalar_lea.vmem [#allocation14], %s2380_s28 }
  0xd9   : > { %1995 = dma.done.wait (%p2153_p8), %s677_s13, 256  }
  0xda   : > { %1997 = vsyncadd (%p2153_p8), %s677_s13, 4294967040  ;;  %s689_s20 = scalar_lea.vmem [#allocation16], %s2380_s28  ;;  %s695_s5 = scalar_lea.sflag [#allocation18], %s2355_s23 }
  0xdb   : > { %s698_s29 = scalar_lea.vmem [#allocation17], %s2358_s18 }
  0xdc   : > { %1999 = dma.done.wait (%p2153_p8), %s695_s5, 256  }
  0xdd   : > { %2001 = vsyncadd (%p2153_p8), %s695_s5, 4294967040  ;;  %v1483_v0 = vld [vmem:[%s662_s24] sm:$0xff]   ;;  %v1487_v5 = vld [vmem:[%s671_s27] sm:$0xff]   ;;  %s2853_s30 = sld [smem:[#allocation30_spill]]  ;;  %s779_s14 = scalar_lea.vmem [#allocation19], %s2380_s28 }
  0xde   : > { %v2402_v1 = vunpack.c.l.bf16 %v1483_v0  ;;  %v2404_v2 = vunpack.c.h.bf16 %v1483_v0  ;;  %v2408_v10 = vunpack.c.l.bf16 %v1487_v5  ;;  %v2410_v11 = vunpack.c.h.bf16 %v1487_v5  ;;  %v1491_v12 = vld [vmem:[%s680_s1] sm:$0xff]   ;;  %v2422_v19 = vld [vmem:[%s617_s22 + $0x8] sm:$0xff]  ;;  %s2855_s15 = sld [smem:[#allocation43_spill]]  ;;  %s1100_s10 = scalar_lea.sflag [#allocation4], %s2355_s23 }
  0xdf   : > { %v2414_v15 = vunpack.c.l.bf16 %v1491_v12  ;;  %v2418_v16 = vld [vmem:[%s617_s22] sm:$0xff]  ;;  %v2424_v20 = vunpack.c.h.bf16 %v1491_v12  ;;  %v865_v27 = vsub.f32 1.0, %v2422_v19  ;;  %vm797_vm2 = vcmp.eq.f32.partialorder %v2422_v19, 1.0  ;;  %v2448_v36 = vld [vmem:[%s626_s25 + $0x8] sm:$0xff]  ;;  %s1114_s22 = sshll.u32 %s779_s14, 4  ;;  %s2046_s26 = smov [#allocation19]   ;;  %s1115_s22 = int_to_ptr.vmem [resolvable:$true] %s1114_s22 }
  0xe0   : > { %v804_v3 = vand.u32 2147483647, %v2402_v1  ;;  %v805_v4 = vand.u32 2147483647, %v2404_v2  ;;  %v905_v13 = vand.u32 2147483647, %v2408_v10  ;;  %v902_v47 = vmul.f32 %v2410_v11, %v2448_v36 }
  0xe1   : > { %v906_v14 = vand.u32 2147483647, %v2410_v11  ;;  %v830_v23 = vsub.f32 0.0, %v2402_v1  ;;  %v831_v24 = vsub.f32 0.0, %v2404_v2  ;;  %v864_v25 = vsub.f32 1.0, %v2418_v16  ;;  %v2439_v30 = vld [vmem:[%s626_s25] sm:$0xff] }
  0xe2   : > { %v806_v6 = vsub.f32 0.0, %v804_v3  ;;  %v807_v7 = vsub.f32 0.0, %v805_v4  ;;  %v907_v17 = vsub.f32 0.0, %v905_v13  ;;  %v971_v26 = vand.u32 2147483647, %v2414_v15  ;;  %v1495_v37 = vld [vmem:[%s689_s20] sm:$0xff]  }
  0xe3   : > { %v908_v18 = vsub.f32 0.0, %v906_v14  ;;  %vm796_vm0 = vcmp.eq.f32.partialorder %v2418_v16, 1.0  ;;  %vm798_vm1 = vcmp.ne.f32.partialorder %v2418_v16, -100.0  ;;  %v972_v28 = vand.u32 2147483647, %v2424_v20  ;;  %v2464_v43 = vld [vmem:[%s635_s21] sm:$0xff] }
  0xe4   : > { %v808_v8 = vmul.f32 1.442695, %v806_v6  ;;  %v810_v9 = vmul.f32 1.442695, %v807_v7  ;;  %v909_v21 = vmul.f32 1.442695, %v907_v17  ;;  %v866_v35 = vmul.f32 %v864_v25, %v864_v25  ;;  %s2856_s25 = smov %s2855_s15 }
  0xe5   : > { %v911_v22 = vmul.f32 1.442695, %v908_v18  ;;  %vm799_vm3 = vcmp.ne.f32.partialorder %v2422_v19, -100.0  ;;  %v838_v29 = vmax.f32 %v2402_v1, 0.0  ;;  %v973_v31 = vsub.f32 0.0, %v971_v26  ;;  %v1010_v54 = vld [vmem:[%s644_s19] sm:$0xff] }
  0xe6   : > { %1620 = vpow2.f32 %v808_v8  ;;  %v2441_v32 = vmax.f32 %v830_v23, 0.0  ;;  %v2443_v33 = vmax.f32 %v831_v24, 0.0  ;;  %v839_v34 = vmax.f32 %v2404_v2, 0.0  ;;  %v2509_v61 = vld [vmem:[%s644_s19 + $0x8] sm:$0xff]  ;;  %v1499_v3 = vld [vmem:[%s698_s29] sm:$0xff]   ;;  %s1469_s18 = sshll.u32 %s2853_s30, 7 }
  0xe7   : > { %1622 = vpow2.f32 %v810_v9  ;;  %v867_v38 = vmul.f32 %v865_v27, %v865_v27  ;;  %v2455_v39 = vsel %vm798_vm1, %v2418_v16, 0.0  ;;  %vm944_vm4 = vcmp.eq.f32.partialorder %v2439_v30, 1.0  ;;  %v2515_v63 = vld [vmem:[%s635_s21 + $0x8] sm:$0xff]  ;;  %s2710_s21 = scalar_lea.hbm %s2855_s15, %s1469_s18  ;;  %s1928_s19 = scalar_lea.vmem %s1115_s22, 128 }
  0xe8   : > { %1624 = vpow2.f32 %v909_v21  ;;  %v975_v40 = vmul.f32 1.442695, %v973_v31  ;;  %v899_v41 = vmax.f32 %v2408_v10, 0.0  ;;  %v901_v42 = vmul.f32 %v2408_v10, %v2439_v30  ;;  %vm2487_vm8 = vmand %vm796_vm0, %vm944_vm4  ;;  %p1929_p8 = scmp.ne.s32.totalorder %s1115_s22, %s1928_s19  ;;  %s1932_s28 = sshll.u32 %s2046_s26, 4  ;;  %s1933_s28 = int_to_ptr.vmem [resolvable:$false] %s1932_s28 }
  0xe9   : > { %1626 = vpow2.f32 %v911_v22  ;;  %vm945_vm5 = vcmp.eq.f32.partialorder %v2448_v36, 1.0  ;;  %v974_v44 = vsub.f32 0.0, %v972_v28  ;;  %vm844_vm6 = vcmp.ge.f32.partialorder %v2402_v1, 0.0  ;;  %v1042_v28 = vld [vmem:[%s2382_s0] sm:$0xff]  ;;  %p1935_p12 = scmp.lt.s32.totalorder %s1115_s22, %s1933_s28 }
  0xea   : > { %v900_v46 = vmax.f32 %v2410_v11, 0.0  ;;  %1628 = vpow2.f32 %v975_v40  ;;  %v1496_v48 = vunpack.c.l.bf16 %v1495_v37  ;;  %vm845_vm7 = vcmp.ge.f32.partialorder %v2404_v2, 0.0  ;;  %vm2500_vm9 = vmand %vm797_vm2, %vm945_vm5  ;;  %p1930_p0 = pnand %p1929_p8, %p2157_p9 }
  0xeb   : > { %v2476_v51 = vmul.f32 %v866_v35, %v866_v35  ;;  %v2481_v52 = vsel %vm799_vm3, %v2422_v19, 0.0  ;;  %v1497_v55 = vunpack.c.h.bf16 %v1495_v37  ;;  %v2494_v57 = vmul.f32 %v867_v38, %v867_v38 }
  0xec   : > { %v965_v59 = vmax.f32 %v2414_v15, 0.0  ;;  %v967_v60 = vmul.f32 %v2414_v15, %v2464_v43  ;;  %v2511_v62 = vsub.f32 %v899_v41, %v901_v42  ;;  %v977_v0 = vmul.f32 1.442695, %v974_v44  ;;  %v1506_v15 = vld [vmem:[%s698_s29 + $0x8] sm:$0xff]   ;;  %v1464_v44 = vld [vmem:[%s2382_s0 + $0x10] sm:$0xff]  ;;  %p1931_p3 = pneg %p1930_p0 }
  0xed   : > { %vm1016_vm10 = vcmp.gt.f32.partialorder %v1010_v54, 0.0  ;;  %v2519_v4 = vsub.f32 %v900_v46, %v902_v47  ;;  %v2044_v5 = vmov 0.0   ;;  %v1020_v7 = vsub.f32 %v1496_v48, %v1010_v54  ;;  %v1043_v42 = vld [vmem:[%s2382_s0 + $0x8] sm:$0xff] }
  0xee   : > { %v2524_v6 = vsel %vm2487_vm8, 1.0, %v2044_v5  ;;  %v2529_v8 = vsel %vm2500_vm9, 1.0, %v2044_v5  ;;  %v966_v9 = vmax.f32 %v2424_v20, 0.0  ;;  %v1021_v10 = vsub.f32 %v1497_v55, %v2509_v61  ;;  %vm2541_vm11 = vmand %vm796_vm0, %vm1016_vm10 }
  0xef   : > { %v2535_v11 = vmul.f32 %v2424_v20, %v2515_v63  ;;  %v2537_v12 = vsub.f32 %v965_v59, %v967_v60  ;;  %v1500_v14 = vunpack.c.l.bf16 %v1499_v3  ;;  %v2551_v21 = vsel %vm2541_vm11, 1.0, %v2044_v5 }
  0xf0   : > { %v1501_v22 = vunpack.c.h.bf16 %v1499_v3  ;;  %v2555_v27 = vmul.f32 %v1020_v7, %v1020_v7  ;;  %v2558_v37 = vmul.f32 %v1021_v10, %v1021_v10  ;;  %v1504_v38 = vunpack.c.l.bf16 %v1506_v15 }
  0xf1   : > { %v1505_v46 = vunpack.c.h.bf16 %v1506_v15  ;;  %v1056_v53 = vsub.f32 %v1500_v14, %v1042_v28  ;;  %vm1017_vm4 = vcmp.gt.f32.partialorder %v2509_v61, 0.0  ;;  %vm897_vm5 = vcmp.ne.f32.partialorder %v2439_v30, -100.0 }
  0xf2   : > { %v1057_v3 = vsub.f32 %v1501_v22, %v1043_v42  ;;  %v1060_v7 = vsub.f32 %v1504_v38, %v1464_v44  ;;  %v1024_v38 = vsel %vm2541_vm11, %v2555_v27, 0.0  ;;  %vm2045_vm8 = vmmov 1  }
  0xf3   : > { %v2466_v45 = vpop.eup %1620  ;;  %vm2617_vm9 = vmxor %vm796_vm0, %vm2045_vm8  ;;  %v970_v13 = vsub.f32 %v966_v9, %v2535_v11  ;;  %vm1084_vm11 = vcmask 1040384  }
  0xf4   : > { %v2472_v49 = vpop.eup %1622  ;;  %v812_v50 = vadd.f32 1.0, %v2466_v45  ;;  %v815_v18 = vmul.f32 -0.5, %v2466_v45  ;;  %v818_v24 = vand.u32 2147483647, %v2466_v45  ;;  %v846_v48 = vsel %vm844_vm6, 1.0, %v2466_v45  ;;  %vm801_vm10 = vmxor %vm797_vm2, %vm2045_vm8 }
  0xf5   : > { %v821_v56 = vadd.f32 1.0, %v2472_v49  ;;  %v1625_v17 = vpop.eup %1624  ;;  %v824_v25 = vmul.f32 -0.5, %v2472_v49  ;;  %v827_v40 = vand.u32 2147483647, %v2472_v49  ;;  %v1062_v28 = vmul.f32 %v1060_v7, %v1060_v7 }
  0xf6   : > { %1630 = vlog2.f32 %v812_v50  ;;  %v1627_v23 = vpop.eup %1626  ;;  %v913_v26 = vadd.f32 1.0, %v1625_v17  ;;  %v916_v31 = vmul.f32 -0.5, %v1625_v17  ;;  %v816_v47 = vadd.f32 1.0, %v815_v18 }
  0xf7   : > { %1632 = vlog2.f32 %v821_v56  ;;  %v922_v35 = vadd.f32 1.0, %v1627_v23  ;;  %v925_v41 = vmul.f32 -0.5, %v1627_v23  ;;  %vm2567_vm12 = vcmp.lt.f32.partialorder %v818_v24, 0.0004427343  ;;  %v2574_v59 = vpop.eup %1628 }
  0xf8   : > { %1634 = vrcp.f32 %v812_v50  ;;  %v1465_v50 = vld [vmem:[%s2382_s0 + $0x18] sm:$0xff]  ;;  %v825_v55 = vadd.f32 1.0, %v824_v25  ;;  %v919_v58 = vand.u32 2147483647, %v1625_v17  ;;  %v917_v60 = vadd.f32 1.0, %v916_v31  ;;  %s1934_s0 = scalar_lea.vmem %s1933_s28, 256 }
  0xf9   : > { %1636 = vrcp.f32 %v821_v56  ;;  %v847_v56 = vsel %vm845_vm7, 1.0, %v2472_v49  ;;  %vm2576_vm13 = vcmp.lt.f32.partialorder %v827_v40, 0.0004427343  ;;  %v926_v14 = vadd.f32 1.0, %v925_v41  ;;  %p1936_p13 = scmp.lt.s32.totalorder %s1934_s0, %s1928_s19 }
  0xfa   : > { %1638 = vpow2.f32 %v977_v0  ;;  %v928_v0 = vand.u32 2147483647, %v1627_v23  ;;  %v979_v15 = vadd.f32 1.0, %v2574_v59  ;;  %v1061_v18 = vsub.f32 %v1505_v46, %v1465_v50 }
  0xfb   : > { %1640 = vlog2.f32 %v913_v26  ;;  %v817_v24 = vmul.f32 %v2466_v45, %v816_v47  ;;  %v982_v25 = vmul.f32 -0.5, %v2574_v59  ;;  %v1058_v26 = vmul.f32 %v1056_v53, %v1056_v53  ;;  %p1937_p4 = por %p1936_p13, %p1935_p12 }
  0xfc   : > { %1642 = vlog2.f32 %v922_v35  ;;  %v826_v31 = vmul.f32 %v2472_v49, %v825_v55  ;;  %vm2584_vm14 = vcmp.lt.f32.partialorder %v919_v58, 0.0004427343  ;;  %v918_v42 = vmul.f32 %v1625_v17, %v917_v60 }
  0xfd   : > { %1644 = vlog2.f32 %v979_v15  ;;  %vm2591_vm15 = vcmp.lt.f32.partialorder %v928_v0, 0.0004427343  ;;  %v1059_v44 = vmul.f32 %v1057_v3, %v1057_v3  ;;  %v927_v47 = vmul.f32 %v1627_v23, %v926_v14  ;;  %p1938_p5 = pnand %p1937_p4, %p1931_p3 }
  0xfe   : > { %v985_v50 = vand.u32 2147483647, %v2574_v59  ;;  %v1063_v53 = vmul.f32 %v1061_v18, %v1061_v18  ;;  %vm898_vm6 = vcmp.ne.f32.partialorder %v2448_v36, -100.0  ;;  %v983_v60 = vadd.f32 1.0, %v982_v25 }
  0xff   : > { %v1064_v0 = vadd.f32 %v1062_v28, %v1058_v26 }
 0x100   : > { %vm2611_vm7 = vcmp.lt.f32.partialorder %v985_v50, 0.0004427343 }
 0x101   : > { %v1066_v1 = vsel %vm796_vm0, %v1064_v0, 0.0 }
 0x103   : > { %v1631_v35 = vpop.eup %1630 }
 0x104   : > { %v1633_v40 = vpop.eup %1632  ;;  %v814_v41 = vmul.f32 0.6931472, %v1631_v35 }
 0x105   : > { %v1635_v49 = vpop.eup %1634  ;;  %v823_v46 = vmul.f32 0.6931472, %v1633_v40 }
 0x106   : > { %v1637_v55 = vpop.eup %1636  ;;  %v820_v58 = vsel %vm2567_vm12, %v817_v24, %v814_v41  ;;  %v851_v17 = vmul.f32 %v1635_v49, %v846_v48  ;;  %vm2628_vm12 = vmand %vm798_vm1, %vm2617_vm9 }
 0x107   : > { %v2601_v7 = vpop.eup %1638  ;;  %v829_v3 = vsel %vm2576_vm13, %v826_v31, %v823_v46  ;;  %v834_v15 = vadd.f32 %v2441_v32, %v820_v58  ;;  %v840_v23 = vadd.f32 %v838_v29, %v820_v58  ;;  %v853_v14 = vmul.f32 %v1637_v55, %v847_v56  ;;  %vm2636_vm13 = vmand %vm799_vm3, %vm801_vm10 }
 0x108   : > { %v835_v18 = vadd.f32 %v2443_v33, %v829_v3  ;;  %v841_v48 = vadd.f32 %v839_v34, %v829_v3  ;;  %v856_v54 = vsub.f32 1.0, %v851_v17  ;;  %v872_v24 = vmul.f32 %v851_v17, %v851_v17  ;;  %v1641_v32 = vpop.eup %1640  ;;  %vm2652_vm1 = vmand %vm797_vm2, %vm1017_vm4 }
 0x109   : > { %v836_v25 = vsub.f32 0.0, %v834_v15  ;;  %v842_v26 = vsub.f32 0.0, %v840_v23  ;;  %v857_v28 = vsub.f32 1.0, %v853_v14  ;;  %v873_v35 = vmul.f32 %v853_v14, %v853_v14  ;;  %v1643_v56 = vpop.eup %1642 }
 0x10a   : > { %v837_v2 = vsub.f32 0.0, %v835_v18  ;;  %v843_v29 = vsub.f32 0.0, %v841_v48  ;;  %v858_v33 = vmul.f32 %v856_v54, %v856_v54  ;;  %v988_v34 = vadd.f32 1.0, %v2601_v7  ;;  %v1645_v45 = vpop.eup %1644 }
 0x10b   : > { %v854_v31 = vsub.f32 0.0, %v836_v25  ;;  %v859_v40 = vmul.f32 %v857_v28, %v857_v28  ;;  %v870_v41 = vsub.f32 0.0, %v842_v26  ;;  %v915_v49 = vmul.f32 0.6931472, %v1641_v32 }
 0x10c   : > { %v855_v46 = vsub.f32 0.0, %v837_v2  ;;  %v871_v50 = vsub.f32 0.0, %v843_v29  ;;  %v924_v55 = vmul.f32 0.6931472, %v1643_v56  ;;  %1646 = vlog2.f32 %v988_v34 }
 0x10d   : > { %v860_v17 = vmul.f32 %v858_v33, %v854_v31  ;;  %v874_v3 = vmul.f32 %v872_v24, %v870_v41  ;;  %v921_v15 = vsel %vm2584_vm14, %v918_v42, %v915_v49  ;;  %v1065_v23 = vadd.f32 %v1063_v53, %v1059_v44 }
 0x10e   : > { %v861_v18 = vmul.f32 %v859_v40, %v855_v46  ;;  %v875_v48 = vmul.f32 %v873_v35, %v871_v50  ;;  %v930_v54 = vsel %vm2591_vm15, %v927_v47, %v924_v55  ;;  %v931_v25 = vadd.f32 %v921_v15, %v2511_v62 }
 0x10f   : > { %v862_v24 = vsel %vm796_vm0, %v860_v17, 0.0  ;;  %v876_v22 = vmul.f32 %v874_v3, %v2476_v51  ;;  %v932_v42 = vadd.f32 %v930_v54, %v2519_v4  ;;  %v984_v44 = vmul.f32 %v2574_v59, %v983_v60 }
 0x110   : > { %v863_v62 = vsel %vm797_vm2, %v861_v18, 0.0  ;;  %v877_v47 = vmul.f32 %v875_v48, %v2494_v57  ;;  %v933_v51 = vsel %vm897_vm5, %v931_v25, 0.0  ;;  %v991_v4 = vmul.f32 -0.5, %v2601_v7 }
 0x111   : > { %v878_v61 = vsel %vm2628_vm12, %v876_v22, 0.0  ;;  %v934_v59 = vsel %vm898_vm6, %v932_v42, 0.0  ;;  %v935_v60 = vmul.f32 %v933_v51, %v2455_v39  ;;  %v981_v26 = vmul.f32 0.6931472, %v1645_v45 }
 0x112   : > { %v879_v28 = vsel %vm2636_vm13, %v877_v47, 0.0  ;;  %v880_v35 = vadd.f32 %v878_v61, %v862_v24  ;;  %v936_v57 = vmul.f32 %v934_v59, %v2481_v52  ;;  %v1025_v30 = vsel %vm2652_vm1, %v2558_v37, 0.0 }
 0x113   : > { %v881_v32 = vadd.f32 %v879_v28, %v863_v62  ;;  %v1067_v36 = vsel %vm797_vm2, %v1065_v23, 0.0  ;;  %v1075_v2 = vsel %vm796_vm0, 1.0, %v2044_v5  ;;  %v987_v33 = vsel %vm2611_vm7, %v984_v44, %v981_v26 }
 0x114   : > { %v937_v29 = vadd.f32 %v936_v57, %v935_v60  ;;  %v992_v34 = vadd.f32 1.0, %v991_v4  ;;  %v1076_v37 = vsel %vm797_vm2, 1.0, %v2044_v5  ;;  %v994_v31 = vand.u32 2147483647, %v2601_v7 }
 0x115   : > { %v882_v56 = vadd.f32 %v881_v32, %v880_v35  ;;  %v1026_v0 = vadd.f32 %v1025_v30, %v1024_v38  ;;  %v1034_v16 = vsel %vm2652_vm1, 1.0, %v2044_v5  ;;  %v1068_v10 = vadd.f32 %v1067_v36, %v1066_v1 }
 0x116   : > { %v938_v40 = vrot.slane %v937_v29, 4  ;;  %vm963_vm0 = vcmp.ne.f32.partialorder %v2464_v43, -100.0  ;;  %v997_v19 = vadd.f32 %v987_v33, %v2537_v12  ;;  %v1077_v49 = vadd.f32 %v1076_v37, %v1075_v2 }
 0x117   : > { %v883_v41 = vrot.slane %v882_v56, 4  ;;  %v950_v46 = vadd.f32 %v2529_v8, %v2524_v6  ;;  %v993_v27 = vmul.f32 %v2601_v7, %v992_v34  ;;  %v1035_v38 = vadd.f32 %v1034_v16, %v2551_v21 }
 0x118   : > { %v939_v55 = vadd.f32 %v938_v40, %v937_v29  ;;  %vm995_vm2 = vcmp.lt.f32.partialorder %v994_v31, 0.0004427343  ;;  %v1027_v58 = vrot.slane %v1026_v0, 4  ;;  %v1069_v17 = vrot.slane %v1068_v10, 4 }
 0x119   : > { %v1647_v5 = vpop.eup %1646  ;;  %v884_v50 = vadd.f32 %v883_v41, %v882_v56  ;;  %v999_v12 = vsel %vm963_vm0, %v997_v19, 0.0  ;;  %v1078_v3 = vrot.slane %v1077_v49, 4  ;;  %v951_v15 = vrot.slane %v950_v46, 4 }
 0x11a   : > { %v990_v43 = vmul.f32 0.6931472, %v1647_v5  ;;  %vm964_vm3 = vcmp.ne.f32.partialorder %v2515_v63, -100.0  ;;  %v1036_v8 = vrot.slane %v1035_v38, 4  ;;  %v940_v9 = vrot.slane %v939_v55, 2 }
 0x11b   : > { %v885_v20 = vrot.slane %v884_v50, 2  ;;  %v1028_v7 = vadd.f32 %v1027_v58, %v1026_v0  ;;  %v1001_v21 = vmul.f32 %v999_v12, %v2455_v39  ;;  %v1070_v23 = vadd.f32 %v1069_v17, %v1068_v10 }
 0x11c   : > { %v996_v6 = vsel %vm995_vm2, %v993_v27, %v990_v43  ;;  %v1079_v18 = vadd.f32 %v1078_v3, %v1077_v49  ;;  %v952_v48 = vadd.f32 %v951_v15, %v950_v46  ;;  %v941_v24 = vadd.f32 %v940_v9, %v939_v55 }
 0x11d   : > { %v998_v11 = vadd.f32 %v996_v6, %v970_v13  ;;  %v886_v25 = vadd.f32 %v885_v20, %v884_v50  ;;  %v1029_v22 = vrot.slane %v1028_v7, 2  ;;  %v1037_v42 = vadd.f32 %v1036_v8, %v1035_v38 }
 0x11e   : > { %v1071_v63 = vrot.slane %v1070_v23, 2  ;;  %v1080_v53 = vrot.slane %v1079_v18, 2  ;;  %v953_v45 = vrot.slane %v952_v48, 2  ;;  %v942_v51 = vrot.slane %v941_v24, 1 }
 0x11f   : > { %v1000_v14 = vsel %vm964_vm3, %v998_v11, 0.0  ;;  %v887_v47 = vrot.slane %v886_v25, 1  ;;  %v1030_v4 = vadd.f32 %v1029_v22, %v1028_v7  ;;  %v1038_v61 = vrot.slane %v1037_v42, 2 }
 0x120   : > { %v1002_v54 = vmul.f32 %v1000_v14, %v2481_v52  ;;  %v1072_v59 = vadd.f32 %v1071_v63, %v1070_v23  ;;  %v1081_v60 = vadd.f32 %v1080_v53, %v1079_v18  ;;  %v954_v26 = vadd.f32 %v953_v45, %v952_v48 }
 0x121   : > { %v888_v35 = vadd.f32 %v887_v47, %v886_v25  ;;  %v943_v52 = vadd.f32 %v942_v51, %v941_v24  ;;  %v1031_v57 = vrot.slane %v1030_v4, 1  ;;  %v1039_v30 = vadd.f32 %v1038_v61, %v1037_v42 }
 0x122   : > { %v1003_v44 = vadd.f32 %v1002_v54, %v1001_v21  ;;  %v1073_v1 = vrot.slane %v1072_v59, 1  ;;  %v1082_v36 = vrot.slane %v1081_v60, 1  ;;  %v955_v2 = vrot.slane %v954_v26, 1 }
 0x123   : > { %v1032_v33 = vadd.f32 %v1031_v57, %v1030_v4  ;;  %v1040_v34 = vrot.slane %v1039_v30, 1  ;;  %v1085_v37 = vsel %vm1084_vm11, %v888_v35, %v943_v52  ;;  %vm1086_vm14 = vcmask 1041408  }
 0x124   : > { %v1004_v62 = vrot.slane %v1003_v44, 4  ;;  %v1074_v31 = vadd.f32 %v1073_v1, %v1072_v59  ;;  %vm1088_vm15 = vcmask 1042432   ;;  %v1083_v0 = vadd.f32 %v1082_v36, %v1081_v60 }
 0x125   : > { %vm1090_vm4 = vcmask 1043456   ;;  %v956_v16 = vadd.f32 %v955_v2, %v954_v26  ;;  %vm1092_vm5 = vcmask 1044480   ;;  %v1041_v10 = vadd.f32 %v1040_v34, %v1039_v30 }
 0x126   : > { %v1005_v39 = vadd.f32 %v1004_v62, %v1003_v44  ;;  %vm1094_vm6 = vcmask 1045504   ;;  %vm1096_vm7 = vcmask 1046528  }
 0x128   : > { %v1006_v28 = vrot.slane %v1005_v39, 2 }
 0x12a   : > { %v1007_v32 = vadd.f32 %v1006_v28, %v1005_v39 }
 0x12c   : > { %v1008_v29 = vrot.slane %v1007_v32, 1 }
 0x12e   : > { %v1009_v56 = vadd.f32 %v1008_v29, %v1007_v32 }
 0x130   : > { %v1087_v40 = vsel %vm1086_vm14, %v1085_v37, %v1009_v56 }
 0x131   : > { %v1089_v41 = vsel %vm1088_vm15, %v1087_v40, %v1032_v33 }
 0x132   : > { %v1091_v19 = vsel %vm1090_vm4, %v1089_v41, %v1074_v31 }
 0x133   : > { %v1093_v49 = vsel %vm1092_vm5, %v1091_v19, %v1083_v0 }
 0x134   : > { %v1095_v46 = vsel %vm1094_vm6, %v1093_v49, %v956_v16 }
 0x135   : > { %v1097_v13 = vsel %vm1096_vm7, %v1095_v46, %v1041_v10 }
 0x136   : > { %1098 = vst [vmem:[%s779_s14] sm:$0xff] %v1097_v13 }
 0x137   : > { %1941 = shalt.err (!%p1938_p5)
}
 0x138   : > { %s1942_s16 = scalar_lea.hbm %s2710_s21, 128  ;;  %s1946_s27 = scalar_lea.hbm %s2856_s25, 256 }
 0x139   : > { %p1943_p6 = scmp.ne.s32.totalorder %s2710_s21, %s1942_s16  ;;  %p1947_p7 = scmp.lt.s32.totalorder %s2710_s21, %s2856_s25 }
 0x13a   : > { %p1948_p10 = scmp.lt.s32.totalorder %s1946_s27, %s1942_s16 }
 0x13b   : > { %p1944_p1 = pnand %p1943_p6, %p2157_p9 }
 0x13c   : > { %p1949_p8 = por %p1948_p10, %p1947_p7 }
 0x13d   : > { %p1945_p2 = pneg %p1944_p1 }
 0x13f   : > { %p1950_p0 = pnand %p1949_p8, %p1945_p2 }
 0x141   : > { %1953 = shalt.err (!%p1950_p0)
}
 0x142   : > { %1527 = dma.vmem_to_hbm [thread:$0]  (%p2157_p9), %s1115_s22, 128, %s2710_s21, %s1100_s10  }
 0x143 PF: > { %s2857_s20 = sld [smem:[#allocation27_spill]] }
 0x144   : > { %s2859_s29 = sld [smem:[#allocation31_spill]] }
 0x149   : > { %s1126_s30 = sand.u32 1, %s2857_s20  }
 0x14a   : > { %p2860_p3 = scmp.ge.s32.totalorder %s2859_s29, 2  ;;  %s1127_s18 = scalar_lea.sflag [#allocation4], %s1126_s30 }
 0x14c   : > { %p1561_p12 = pnand %p2860_p3, %p2164_p11 }
 0x14e   : > { %p1562_p13 = pneg %p1561_p12 }
 0x150   : > { %2003 = dma.done.wait (%p1562_p13), %s1127_s18, 128  }
 0x151   : > { %2005 = vsyncadd (%p1562_p13), %s1127_s18, 4294967168  ;;  %s41_s18 = sadd.s32 1, %s2859_s29   ;;  %s2861_s13 = sld [smem:[#allocation28_spill]] }
 0x152   : > { %p38_p4 = scmp.ge.s32.totalorder %s41_s18, 4   ;;  %s2862_s14 = sld [smem:[#allocation29_spill]] }
 0x153   : > { %s2863_s15 = sld [smem:[#allocation36_spill]]  ;;  %s2865_s16 = smov %s2024_s17 }
 0x154   : > { %s2864_s11 = sld [smem:[#allocation33_spill]] }
 0x156   :  { %40 = sbr.rel (!%p38_p4) target bundleno = 22 (0x16), region = 216 }
 0x15a   : > { %s2866_s17 = smov %s2864_s11 }
 0x15b   :  { %1132 = vsyncpa [#allocation3], 1 }
 0x15c   :  { %1134 = vsyncpa [#allocation3 + $0x1], 1 }
 0x15d   :  { %1135 = vsyncpa [#allocation6], 1 }
 0x15e   :  { %1137 = vsyncpa [#allocation6 + $0x1], 1 }
 0x15f   :  { %1138 = vsyncpa [#allocation9], 1 }
 0x160   :  { %1140 = vsyncpa [#allocation9 + $0x1], 1 }
 0x161   :  { %1141 = vsyncpa [#allocation12], 1 }
 0x162   :  { %1143 = vsyncpa [#allocation12 + $0x1], 1 }
 0x163   :  { %1144 = vsyncpa [#allocation15], 1 }
 0x164   :  { %1146 = vsyncpa [#allocation15 + $0x1], 1 }
 0x165   :  { %1147 = vsyncpa [#allocation18], 1 }
 0x166   :  { %1149 = vsyncpa [#allocation18 + $0x1], 1 }
 0x167   :  { %1150 = vsyncpa [#allocation4], 1 }
 0x168   :  { %1152 = vsyncpa [#allocation4 + $0x1], 1 }

</bundles_post_ra>
